<compile_context>
chip_gen: v7x
topology: tpu7x:2x2x1
jax: 0.10.0
libtpu: 0.0.40
codegen_flags: <defaults>
</compile_context>

<pallas_src>
import functools
import math

import jax
import jax.numpy as jnp
from jax.experimental import pallas as pl
from jax.experimental.pallas import tpu as pltpu


# ------------------------ generation-aware VMEM budgets ----------------------

def _vmem_capacity_bytes():
    try:
        info = pltpu.get_tpu_info()
        cap = getattr(info, "vmem_capacity_bytes", None)
        if cap:
            return int(cap)
    except Exception:
        pass
    return 64 * 1024 * 1024      # conservative (v7x-sized) fallback


_VMEM_CAP = _vmem_capacity_bytes()
if _VMEM_CAP >= 96 * 1024 * 1024:        # v5e / v6e: 128 MiB physical VMEM
    _VMEM_LIMIT = 80 * 1024 * 1024
    _CONV_BUDGET = 48 * 1024 * 1024
    _POOL_BUDGET = 20 * 1024 * 1024
else:                                    # v7x (64 MiB / TensorCore) or unknown
    _VMEM_LIMIT = 44 * 1024 * 1024
    _CONV_BUDGET = 24 * 1024 * 1024
    _POOL_BUDGET = 10 * 1024 * 1024


def _lane_pad(c):
    return ((c + 127) // 128) * 128


# ----------------------------- Pallas kernels --------------------------------

def _gemm_bias_act_kernel(p_ref, w_ref, b_ref, o_ref, *, relu):
    # p_ref: (1, rows, K) bf16   w_ref: (K, tco) bf16   b_ref: (1, tco) f32
    acc = jnp.dot(p_ref[0], w_ref[...], preferred_element_type=jnp.float32)
    acc = acc + b_ref[...]
    if relu:
        acc = jnp.maximum(acc, 0.0)
    o_ref[0] = acc.astype(o_ref.dtype)


def _conv_slab_kernel(xp_hbm, w_ref, b_ref, o_ref, slab, sems, *,
                      kh_kw, d, Wp, Wout, TH, n_rows, slab_alloc, relu, pool):
    # xp_hbm: (B, (Hp+1)*Wp, Cin) bf16 in HBM (zero-padded activation, flat HW)
    # w_ref : (KH*KW, Cin, tco) bf16   b_ref: (1, tco) f32
    # o_ref : (1, TH, Wout, tco) or (1, TH//2, Wout//2, tco) if pool fused
    # slab  : (2, slab_alloc, Cin) bf16 VMEM double buffer
    KH, KW = kh_kw
    bi = pl.program_id(0)
    ri = pl.program_id(1)
    ci = pl.program_id(2)
    slot = ri % 2

    def _start(row_tile, dst_slot):
        pltpu.make_async_copy(
            xp_hbm.at[bi, pl.ds(row_tile * TH * Wp, slab_alloc), :],
            slab.at[dst_slot],
            sems.at[dst_slot]).start()

    # The slab is shared by all Cout tiles of this (batch, row) cell; it is
    # (pre)fetched only on the first Cout step (Cout axis is "arbitrary").
    @pl.when(ci == 0)
    def _():
        @pl.when(ri == 0)
        def _():
            _start(0, 0)                       # first tile of this batch: exposed

        pltpu.make_async_copy(                 # wait for the current tile's slab
            xp_hbm.at[bi, pl.ds(0, slab_alloc), :],
            slab.at[slot],
            sems.at[slot]).wait()

        @pl.when(ri + 1 < n_rows)
        def _():
            _start(ri + 1, 1 - slot)           # prefetch next row tile

    M = TH * Wp
    tco = w_ref.shape[-1]
    cur = slab.at[slot]

    acc = jnp.dot(cur[pl.ds(0, M), :], w_ref[0],
                  preferred_element_type=jnp.float32)
    for t in range(1, KH * KW):
        kh, kw = divmod(t, KW)
        off = kh * d * Wp + kw * d
        acc = acc + jnp.dot(cur[pl.ds(off, M), :], w_ref[t],
                            preferred_element_type=jnp.float32)

    acc = acc + b_ref[...]
    if relu:
        acc = jnp.maximum(acc, 0.0)

    a = acc.reshape(TH, Wp, tco)[:, :Wout, :]           # drop padded-W columns
    if pool:                                            # fused 2x2/s2 maxpool
        a = a.reshape(TH, Wout // 2, 2, tco)
        a = jnp.maximum(a[:, :, 0, :], a[:, :, 1, :])   # (TH, Wout//2, tco)
        a = jnp.maximum(a[0::2], a[1::2])               # (TH//2, Wout//2, tco)
    o_ref[0] = a.astype(o_ref.dtype)


def _pool2x2_kernel(x_ref, o_ref, *, c):
    # x_ref: (1, TH, 2, Wout, 2*C) laid out as [b, ho, sh, wo, sw*C + ch]
    m = jnp.maximum(x_ref[0, :, 0, :, :], x_ref[0, :, 1, :, :])   # (TH, Wout, 2C)
    o_ref[0] = jnp.maximum(m[:, :, :c], m[:, :, c:])


def _pool_taps_kernel(t_ref, o_ref, *, kk):
    # t_ref: (1, KK, rows, C)   o_ref: (1, rows, C)
    m = t_ref[0, 0]
    for k in range(1, kk):
        m = jnp.maximum(m, t_ref[0, k])
    o_ref[0] = m


# ------------------------------- tile pickers --------------------------------

def _row_candidates(Hout, Wout):
    return [t for t in range(Hout, 0, -1)
            if Hout % t == 0 and ((t * Wout) % 8 == 0 or t == Hout)]


def _divisors_desc(n, *, even=False):
    ds = [t for t in range(n, 0, -1) if n % t == 0]
    if even:
        ds = [t for t in ds if t % 2 == 0]
    return ds or [n]


def _pick_rows_gemm(Hout, Wout, K, tco, budget=_CONV_BUDGET):
    cands = _row_candidates(Hout, Wout)
    Kp, Cp = _lane_pad(K), _lane_pad(tco)
    for th in cands:
        rows = th * Wout
        in_b = 2 * rows * Kp * 2                 # bf16 lhs, double buffered
        w_b = 2 * K * Cp * 2
        o_b = 2 * rows * Cp * 2                  # bf16 out, double buffered
        live = rows * Cp * 4 + rows * Kp * 2     # f32 accumulator + lhs value
        if in_b + w_b + o_b + live <= budget:
            return th
    return cands[-1]


def _pick_rows_slab(Hout, Wp, Wout, Cin, tco, KH, KW, d, pool,
                    budget=_CONV_BUDGET):
    cands = _divisors_desc(Hout, even=bool(pool))
    Cip, Cop = _lane_pad(Cin), _lane_pad(tco)
    for th in cands:
        slab_alloc = (th + (KH - 1) * d) * Wp + (KW - 1) * d
        slab_b = 2 * slab_alloc * Cip * 2                # bf16, 2 slots
        w_b = 2 * KH * KW * Cin * Cop * 2                # double buffered
        m = th * Wp
        acc_b = 2 * m * Cop * 4 + m * Cip * 2            # acc + dot temp + lhs
        out_rows = (th // 2) * (Wout // 2) if pool else th * Wout
        o_b = 2 * out_rows * Cop * 2                     # bf16 out, double buf
        if slab_b + w_b + acc_b + o_b <= budget:
            return th
    return cands[-1]


# --------------------------------- wrappers -----------------------------------

def maxpool2d_2x2(x, *, ceil_mode=False):
    """Standalone MaxPool2d(2, 2) with torch ceil_mode semantics (fallback)."""
    B, H, W, C = x.shape
    Hout = -(-H // 2) if ceil_mode else H // 2
    Wout = -(-W // 2) if ceil_mode else W // 2
    Hn, Wn = 2 * Hout, 2 * Wout
    if Hn > H or Wn > W:                       # ceil_mode with odd extent
        x = jnp.pad(x, ((0, 0), (0, Hn - H), (0, Wn - W), (0, 0)),
                    constant_values=float("-inf"))
    elif Hn < H or Wn < W:                     # floor mode with odd extent
        x = x[:, :Hn, :Wn, :]
    x6 = x.reshape(B, Hout, 2, Wout, 2 * C)    # free reshape; max done in-kernel

    itemsize = x.dtype.itemsize
    Cp = _lane_pad(C)
    row_bytes = (2 * Wout * 2 * Cp + Wout * Cp) * itemsize
    cands = _divisors_desc(Hout)
    TH = next((t for t in cands if t * row_bytes * 2 <= _POOL_BUDGET), cands[-1])

    return pl.pallas_call(
        functools.partial(_pool2x2_kernel, c=C),
        out_shape=jax.ShapeDtypeStruct((B, Hout, Wout, C), x.dtype),
        grid_spec=pltpu.PrefetchScalarGridSpec(
            num_scalar_prefetch=0,
            grid=(B, Hout // TH),
            in_specs=[pl.BlockSpec((1, TH, 2, Wout, 2 * C),
                                   lambda bi, i: (bi, i, 0, 0, 0))],
            out_specs=pl.BlockSpec((1, TH, Wout, C), lambda bi, i: (bi, i, 0, 0)),
        ),
        compiler_params=pltpu.CompilerParams(
            dimension_semantics=("parallel", "parallel"),
            vmem_limit_bytes=_VMEM_LIMIT),
    )(x6)


def maxpool2d_taps(x, *, kernel_size, stride, padding):
    """General MaxPool2d (used for pool5: 3x3, stride 1, pad 1)."""
    B, H, W, C = x.shape
    k, s, p = kernel_size, stride, padding
    Hout = (H + 2 * p - k) // s + 1
    Wout = (W + 2 * p - k) // s + 1
    xp = jnp.pad(x, ((0, 0), (p, p), (p, p), (0, 0)),
                 constant_values=float("-inf"))
    taps = []
    for kh in range(k):
        for kw in range(k):
            taps.append(xp[:, kh:kh + (Hout - 1) * s + 1:s,
                            kw:kw + (Wout - 1) * s + 1:s, :])
    t = jnp.stack(taps, axis=1).reshape(B, k * k, Hout * Wout, C)

    itemsize = x.dtype.itemsize
    row_bytes = (k * k + 1) * Wout * _lane_pad(C) * itemsize
    cands = _row_candidates(Hout, Wout)
    TH = next((th for th in cands if th * row_bytes * 2 <= _POOL_BUDGET),
              cands[-1])
    rows = TH * Wout

    out = pl.pallas_call(
        functools.partial(_pool_taps_kernel, kk=k * k),
        out_shape=jax.ShapeDtypeStruct((B, Hout * Wout, C), x.dtype),
        grid_spec=pltpu.PrefetchScalarGridSpec(
            num_scalar_prefetch=0,
            grid=(B, Hout // TH),
            in_specs=[pl.BlockSpec((1, k * k, rows, C),
                                   lambda bi, i: (bi, 0, i, 0))],
            out_specs=pl.BlockSpec((1, rows, C), lambda bi, i: (bi, i, 0)),
        ),
        compiler_params=pltpu.CompilerParams(
            dimension_semantics=("parallel", "parallel"),
            vmem_limit_bytes=_VMEM_LIMIT),
    )(t)
    return out.reshape(B, Hout, Wout, C)


def conv2d_relu(x, w_hwio, b, *, padding, dilation=1, relu=True, pool=None):
    """KxK conv (stride 1) + bias + ReLU, optionally fusing a following 2x2/s2
    maxpool (`pool` in (None, 'M', 'C')).  bf16 MXU inputs, f32 accumulation,
    bf16 outputs."""
    B, H, W, Cin = x.shape
    KH, KW, _, Cout = w_hwio.shape
    d, p = dilation, padding
    Hout = H + 2 * p - d * (KH - 1)
    Wout = W + 2 * p - d * (KW - 1)

    tco = 512 if Cout % 512 == 0 else (256 if Cout % 256 == 0 else Cout)
    n_co = Cout // tco
    b2 = b.reshape(1, Cout).astype(jnp.float32)
    xb = x.astype(jnp.bfloat16)
    out_dtype = jnp.bfloat16

    # --- path A: pure GEMM (1x1 conv, or tiny-Cin full im2col for the RGB stem)
    if (KH == 1 and KW == 1 and p == 0) or Cin < 8:
        if KH == 1 and KW == 1:
            K = Cin
            pw = xb.reshape(B, H * W, Cin)
            w2 = w_hwio.reshape(Cin, Cout).astype(jnp.bfloat16)
        else:
            # Full im2col (K = KH*KW*Cin); only for Cin < 8 where the extra HBM
            # traffic is negligible and the slab path's contraction would be
            # pathologically narrow.
            K = KH * KW * Cin
            xpad = jnp.pad(xb, ((0, 0), (p, p), (p, p), (0, 0)))
            pats = [xpad[:, kh * d:kh * d + Hout, kw * d:kw * d + Wout, :]
                    for kh in range(KH) for kw in range(KW)]
            pw = jnp.concatenate(pats, axis=-1).reshape(B, Hout * Wout, K)
            w2 = w_hwio.reshape(K, Cout).astype(jnp.bfloat16)

        TH = _pick_rows_gemm(Hout, Wout, K, tco)
        rows = TH * Wout
        out = pl.pallas_call(
            functools.partial(_gemm_bias_act_kernel, relu=relu),
            out_shape=jax.ShapeDtypeStruct((B, Hout * Wout, Cout), out_dtype),
            grid_spec=pltpu.PrefetchScalarGridSpec(
                num_scalar_prefetch=0,
                grid=(B, Hout // TH, n_co),
                in_specs=[
                    pl.BlockSpec((1, rows, K), lambda bi, i, j: (bi, i, 0)),
                    pl.BlockSpec((K, tco), lambda bi, i, j: (0, j)),
                    pl.BlockSpec((1, tco), lambda bi, i, j: (0, j)),
                ],
                out_specs=pl.BlockSpec((1, rows, tco),
                                       lambda bi, i, j: (bi, i, j)),
            ),
            compiler_params=pltpu.CompilerParams(
                dimension_semantics=("parallel", "parallel", "parallel"),
                vmem_limit_bytes=_VMEM_LIMIT),
        )(pw, w2, b2)
        out = out.reshape(B, Hout, Wout, Cout)
        if pool is not None:
            out = maxpool2d_2x2(out, ceil_mode=(pool == "C"))
        return out

    # --- path B: general KxK, stride 1, dilation d.  No HBM im2col: the padded
    # activation slab is DMA'd (double-buffered, prefetched) into VMEM and the
    # KH*KW taps are accumulated from shifted views (K = Cin).
    fuse_pool = (pool is not None) and (Hout % 2 == 0) and (Wout % 2 == 0)
    Hp, Wp = H + 2 * p, W + 2 * p
    # One extra zero row at the bottom so the DMA of the last tile (which
    # includes the (KW-1)*d overhang read by the largest tap) stays in bounds.
    xp = jnp.pad(xb, ((0, 0), (p, p + 1), (p, p), (0, 0)))
    xp = xp.reshape(B, (Hp + 1) * Wp, Cin)
    w3 = w_hwio.reshape(KH * KW, Cin, Cout).astype(jnp.bfloat16)

    TH = _pick_rows_slab(Hout, Wp, Wout, Cin, tco, KH, KW, d, fuse_pool)
    n_rows = Hout // TH
    slab_alloc = (TH + (KH - 1) * d) * Wp + (KW - 1) * d

    if fuse_pool:
        out_shape = jax.ShapeDtypeStruct((B, Hout // 2, Wout // 2, Cout),
                                         out_dtype)
        out_spec = pl.BlockSpec((1, TH // 2, Wout // 2, tco),
                                lambda bi, i, j: (bi, i, 0, j))
    else:
        out_shape = jax.ShapeDtypeStruct((B, Hout, Wout, Cout), out_dtype)
        out_spec = pl.BlockSpec((1, TH, Wout, tco),
                                lambda bi, i, j: (bi, i, 0, j))

    out = pl.pallas_call(
        functools.partial(_conv_slab_kernel, kh_kw=(KH, KW), d=d, Wp=Wp,
                          Wout=Wout, TH=TH, n_rows=n_rows,
                          slab_alloc=slab_alloc, relu=relu, pool=fuse_pool),
        out_shape=out_shape,
        grid_spec=pltpu.PrefetchScalarGridSpec(
            num_scalar_prefetch=0,
            grid=(B, n_rows, n_co),
            in_specs=[
                pl.BlockSpec(memory_space=pl.ANY),          # padded act in HBM
                pl.BlockSpec((KH * KW, Cin, tco), lambda bi, i, j: (0, 0, j)),
                pl.BlockSpec((1, tco), lambda bi, i, j: (0, j)),
            ],
            out_specs=out_spec,
            scratch_shapes=[pltpu.VMEM((2, slab_alloc, Cin), jnp.bfloat16),
                            pltpu.SemaphoreType.DMA((2,))],
        ),
        compiler_params=pltpu.CompilerParams(
            # Only the batch axis is "parallel": the per-batch slab prefetch
            # chain (row tile ri -> ri+1) must stay on one TensorCore.
            dimension_semantics=("parallel", "arbitrary", "arbitrary"),
            vmem_limit_bytes=_VMEM_LIMIT),
    )(xp, w3, b2)

    if pool is not None and not fuse_pool:
        out = maxpool2d_2x2(out, ceil_mode=(pool == "C"))
    return out


# ----------------------------------- model ------------------------------------

class VGGModelPallas:
    """Pallas reimplementation of VGGModel (vgg512_ssd backbone), batch_norm=False."""

    def __init__(self, cfg, batch_norm=False, key=jax.random.PRNGKey(42)):
        # TODO(synk): batch_norm=True path (Conv+BatchNorm2d+ReLU) not implemented.
        assert not batch_norm, "only batch_norm=False is supported"
        self.cfg = cfg
        self.conv_params = []
        in_ch = 3
        idx = 0
        for v in cfg:
            if v in ("M", "C"):
                continue
            self.conv_params.append(
                self._init_conv(jax.random.fold_in(key, idx), 3, in_ch, v))
            in_ch = v
            idx += 1
        # pool5 + conv6 (512->1024, dilated) + conv7 (1024->1024, 1x1)
        self.conv6 = self._init_conv(jax.random.fold_in(key, 100), 3, 512, 1024)
        self.conv7 = self._init_conv(jax.random.fold_in(key, 101), 1, 1024, 1024)

    @staticmethod
    def _init_conv(key, k, cin, cout):
        wk, bk = jax.random.split(key)
        std = math.sqrt(2.0 / (k * k * cin))
        w = jax.random.normal(wk, (k, k, cin, cout), jnp.float32) * std   # HWIO
        b = jax.random.normal(bk, (cout,), jnp.float32) * 0.01
        return w, b

    def __call__(self, x_nchw):
        x = jnp.transpose(x_nchw, (0, 2, 3, 1)).astype(jnp.bfloat16)  # NCHW->NHWC
        cfg = self.cfg
        pi = 0
        i = 0
        while i < len(cfg):
            v = cfg[i]
            if v in ("M", "C"):
                x = maxpool2d_2x2(x, ceil_mode=(v == "C"))
                i += 1
                continue
            w, b = self.conv_params[pi]
            pi += 1
            nxt = cfg[i + 1] if i + 1 < len(cfg) else None
            if nxt in ("M", "C"):
                x = conv2d_relu(x, w, b, padding=1, pool=nxt)   # fused pool
                i += 2
            else:
                x = conv2d_relu(x, w, b, padding=1)
                i += 1
        x = maxpool2d_taps(x, kernel_size=3, stride=1, padding=1)   # pool5
        w6, b6 = self.conv6
        x = conv2d_relu(x, w6, b6, padding=6, dilation=6)           # conv6 + ReLU
        w7, b7 = self.conv7
        x = conv2d_relu(x, w7, b7, padding=0)                       # conv7 + ReLU
        return jnp.transpose(x, (0, 3, 1, 2)).astype(jnp.float32)   # NHWC -> NCHW


if __name__ == "__main__":
    # Small cfg consistent with the module: the last conv must output 512
    # channels (conv6 is hard-wired 512 -> 1024); input is NCHW with 3 channels.
    cfg = [64, "M", 128, "C", 512]
    model = VGGModelPallas(cfg, batch_norm=False)

    x = jax.random.normal(jax.random.PRNGKey(0), (2, 3, 32, 32), jnp.float32)
    out = model(x)
    out = jax.block_until_ready(out)

    # 32 -> M -> 16 -> C -> 8 spatial; final channels = 1024
    assert out.shape == (2, 1024, 8, 8), out.shape
    assert bool(jnp.all(jnp.isfinite(out)))
    print("KERNEL_OK")
</pallas_src>

<mosaic_0001>
module attributes {stable_mosaic.version = 11 : i64} {
  func.func @_gemm_bias_act_kernel(%arg0: i32, %arg1: i32, %arg2: i32, %arg3: memref<1x1024x27xbf16, #tpu.memory_space<vmem>>, %arg4: memref<27x64xbf16, #tpu.memory_space<vmem>>, %arg5: memref<1x64xf32, #tpu.memory_space<vmem>>, %arg6: memref<1x1024x64xbf16, #tpu.memory_space<vmem>>) attributes {dimension_semantics = [#tpu.dimension_semantics<parallel>, #tpu.dimension_semantics<parallel>, #tpu.dimension_semantics<parallel>], iteration_bounds = array<i64: 2, 1, 1>, scalar_prefetch = 0 : i64, scratch_operands = 0 : i64, tpu.core_type = #tpu.core_type<tc>, window_params = [{transform_indices = @transform_0, window_bounds = array<i64: 1, 1024, 27>}, {transform_indices = @transform_1, window_bounds = array<i64: 27, 64>}, {transform_indices = @transform_2, window_bounds = array<i64: 1, 64>}, {transform_indices = @transform_3, window_bounds = array<i64: 1, 1024, 64>}]} {
    %c0 = arith.constant 0 : index
    %c0_0 = arith.constant 0 : index
    %c0_1 = arith.constant 0 : index
    %0 = vector.load %arg3[%c0, %c0_0, %c0_1] : memref<1x1024x27xbf16, #tpu.memory_space<vmem>>, vector<1x1024x27xbf16>
    %1 = vector.shape_cast %0 : vector<1x1024x27xbf16> to vector<1024x27xbf16>
    %c0_2 = arith.constant 0 : index
    %c0_3 = arith.constant 0 : index
    %2 = vector.load %arg4[%c0_2, %c0_3] : memref<27x64xbf16, #tpu.memory_space<vmem>>, vector<27x64xbf16>
    %cst = arith.constant dense<0.000000e+00> : vector<1024x64xf32>
    %3 = tpu.matmul %1, %2, %cst {dimension_numbers = #tpu.dot_dimension_numbers<[1], [0], [0], [1], [0, 0, 1, 1], [], []>} : vector<1024x27xbf16>, vector<27x64xbf16>, vector<1024x64xf32> -> vector<1024x64xf32>
    %c0_4 = arith.constant 0 : index
    %c0_5 = arith.constant 0 : index
    %4 = vector.load %arg5[%c0_4, %c0_5] : memref<1x64xf32, #tpu.memory_space<vmem>>, vector<1x64xf32>
    %5 = vector.broadcast %4 : vector<1x64xf32> to vector<1024x64xf32>
    %6 = arith.addf %3, %5 : vector<1024x64xf32>
    %cst_6 = arith.constant 0.000000e+00 : f32
    %7 = vector.broadcast %cst_6 : f32 to vector<1024x64xf32>
    %8 = arith.maximumf %6, %7 : vector<1024x64xf32>
    %9 = arith.truncf %8 : vector<1024x64xf32> to vector<1024x64xbf16>
    %c0_7 = arith.constant 0 : index
    %c0_8 = arith.constant 0 : index
    %c0_9 = arith.constant 0 : index
    %10 = vector.load %arg6[%c0_7, %c0_8, %c0_9] : memref<1x1024x64xbf16, #tpu.memory_space<vmem>>, vector<1x1024x64xbf16>
    %11 = vector.shape_cast %10 : vector<1x1024x64xbf16> to vector<1024x64xbf16>
    %12 = vector.shape_cast %9 : vector<1024x64xbf16> to vector<1x1024x64xbf16>
    tpu.vector_store %arg6[%c0_7, %c0_8, %c0_9], %12 {strides = array<i32>} : memref<1x1024x64xbf16, #tpu.memory_space<vmem>>, vector<1x1024x64xbf16>,
    return
  }
  func.func @transform_0(%arg0: i32, %arg1: i32, %arg2: i32) -> (i32, i32, i32) {
    %c0_i32 = arith.constant 0 : i32
    %c0_i32_0 = arith.constant 0 : i32
    return %arg0, %arg1, %c0_i32 : i32, i32, i32
  }
  func.func @transform_1(%arg0: i32, %arg1: i32, %arg2: i32) -> (i32, i32) {
    %c0_i32 = arith.constant 0 : i32
    %c0_i32_0 = arith.constant 0 : i32
    return %c0_i32, %arg2 : i32, i32
  }
  func.func @transform_2(%arg0: i32, %arg1: i32, %arg2: i32) -> (i32, i32) {
    %c0_i32 = arith.constant 0 : i32
    %c0_i32_0 = arith.constant 0 : i32
    return %c0_i32, %arg2 : i32, i32
  }
  func.func @transform_3(%arg0: i32, %arg1: i32, %arg2: i32) -> (i32, i32, i32) {
    %c0_i32 = arith.constant 0 : i32
    return %arg0, %arg1, %arg2 : i32, i32, i32
  }
}

</mosaic_0001>

<bundles_post_ra>
// kernel: tpu_custom_call.1
= control target key start
LH: loop header
LB: loop body
LE: loop exit
PB: predicated region body
PF: predicated region fallthrough
CT: control target
= control target key end

     0   :  { %s3109_s12 = smov 0   ;;  %s3111_s13 = smov 0   ;;  %s3681_s0 = inlined_call_operand.vmem [shape: bf16[2,1024,27], index: 0, kind: input, shape index: {}]   ;;  %s3682_s1 = inlined_call_operand.vmem [shape: bf16[27,64], index: 1, kind: input, shape index: {}]   ;;  %s3683_s2 = inlined_call_operand.vmem [shape: f32[1,64], index: 2, kind: input, shape index: {}]   ;;  %s3684_s3 = inlined_call_operand.vmem [shape: bf16[2,1024,64], index: 3, kind: output, shape index: {}]  }
   0x1   :  { %s3113_s14 = smov 0  }
   0x2 LB: > { %s32_s15 = sadd.s32 1, %s3082_s13  ;;  %p2374_p0 = scmp.ge.s32.totalorder %s3086_s14, 1  ;;  %s3086_s14 = sphi %s3113_s14, %s13_s14   ;;  %s3082_s13 = sphi %s3111_s13, %s3686_s13   ;;  %s3078_s12 = sphi %s3109_s12, %s3685_s12  }
   0x3   : > { %p34_p1 = scmp.ge.s32.totalorder %s32_s15, 2  ;;  %p184_p2 = scmp.lt.s32.totalorder %s3086_s14, 3 }
   0x5   : > { %s3688_s15 = smov (%p34_p1, %s32_s15), 0  ;;  %p185_p3 = pnand %p2374_p0, %p184_p2 }
   0x6   : > { %v2997_v0 = vld [vmem:[%s3682_s1] sm:$0xff] (!%p185_p3)   ;;  %vm920_vm0 = vcmask (!%p185_p3), 1044480   ;;  %v2998_v1 = vld [vmem:[%s3682_s1 + $0x8] sm:$0x3f] (!%p185_p3)   ;;  %vm921_vm1 = vcmask (!%p185_p3), 1045504   ;;  %p227_p4 = scmp.lt.s32.totalorder (!%p185_p3), %s3078_s12, 1 }
   0x7   : > { %188 = sbr.rel (%p185_p3) target bundleno = 362 (0x16a), region = 32  ;;  %2836 = vmatprep.subr.bf16.mxu0 (!%p185_p3), %v2997_v0  ;;  %2968 = vmatprep.subr.bf16.mxu1 (!%p185_p3), %v2997_v0  ;;  %v3088_v2 = vmov (!%p185_p3), 65535   ;;  %vm727_vm2 = vcmask (!%p185_p3), 220160   ;;  %vm2112_vm3 = vcmask (!%p185_p3), 519168  }
   0x8   : > { %2837 = vmatpush3.bf16.msra.mxu0 (!%p185_p3), %v2997_v0  ;;  %2970 = vmatpush3.bf16.msra.mxu1 (!%p185_p3), %v2997_v0  ;;  %v922_v3 = vsel (!%p185_p3), %vm920_vm0, 4294967295, %v3088_v2 }
   0x9   : > { %v923_v4 = vsel (!%p185_p3), %vm921_vm1, %v922_v3, 0 }
   0xa   : > { %v925_v5 = vand.u32 (!%p185_p3), %v2998_v1, %v923_v4 }
   0xc   : > { %2838 = vmatprep.subr.bf16.mxu0 (!%p185_p3), %v925_v5  ;;  %2969 = vmatprep.subr.bf16.mxu1 (!%p185_p3), %v925_v5 }
   0xd   : > { %2839 = vmatpush3.bf16.msra.mxu0 (!%p185_p3), %v925_v5  ;;  %2971 = vmatpush3.bf16.msra.mxu1 (!%p185_p3), %v925_v5 }
   0xe   : > { %s3690_s12 = smov (!%p227_p4, %s3078_s12), 1 }
   0xf   : > { %s2640_s20 = sshll.u32 %s3690_s12, 9 }
  0x10   : > { %s3141_s23 = scalar_lea.vmem %s3681_s0, %s2640_s20  ;;  %s3286_s28 = scalar_lea.vmem %s3684_s3, %s2640_s20 }
  0x11   : > { %v2999_v6 = vld [vmem:[%s3141_s23] sm:$0xff]   ;;  %v3001_v8 = vld [vmem:[%s3141_s23 + $0x8] sm:$0xff]   ;;  %v3003_v10 = vld [vmem:[%s3141_s23 + $0x10] sm:$0xff]  }
  0x12   : > { %v3000_v7 = vld [vmem:[%s3141_s23 + $0x100] sm:$0xff]   ;;  %2840 = vmatprep.mubr.msk.bf16.mxu0 %vm727_vm2, %v2999_v6  ;;  %v3002_v9 = vld [vmem:[%s3141_s23 + $0x108] sm:$0xff]   ;;  %v3004_v11 = vld [vmem:[%s3141_s23 + $0x110] sm:$0xff]  }
  0x13   : > { %2904 = vmatprep.mubr.msk.bf16.mxu1 %vm727_vm2, %v3000_v7  ;;  %2841 = vmatmul.mubr.msk.bf16.vlgmr.msra.gmra.mrb[0].mxu0 %vm727_vm2, %v3001_v8  ;;  %v3005_v12 = vld [vmem:[%s3141_s23 + $0x18] sm:$0xff]   ;;  %v3007_v14 = vld [vmem:[%s3141_s23 + $0x20] sm:$0xff]   ;;  %v3009_v16 = vld [vmem:[%s3141_s23 + $0x28] sm:$0xff]  }
  0x14   : > { %2905 = vmatmul.mubr.msk.bf16.vlgmr.msra.gmra.mrb[0].mxu1 %vm727_vm2, %v3002_v9  ;;  %2844 = vmatprep.mubr.msk.bf16.mxu0 %vm727_vm2, %v3003_v10  ;;  %v3006_v13 = vld [vmem:[%s3141_s23 + $0x118] sm:$0xff]   ;;  %v3008_v15 = vld [vmem:[%s3141_s23 + $0x120] sm:$0xff]   ;;  %v3010_v17 = vld [vmem:[%s3141_s23 + $0x128] sm:$0xff]  }
  0x15   : > { %2908 = vmatprep.mubr.msk.bf16.mxu1 %vm727_vm2, %v3004_v11  ;;  %v3011_v18 = vld [vmem:[%s3141_s23 + $0x30] sm:$0xff]   ;;  %v3013_v20 = vld [vmem:[%s3141_s23 + $0x38] sm:$0xff]   ;;  %v3015_v22 = vld [vmem:[%s3141_s23 + $0x40] sm:$0xff]  }
  0x16   : > { %v3012_v19 = vld [vmem:[%s3141_s23 + $0x130] sm:$0xff]   ;;  %v3014_v21 = vld [vmem:[%s3141_s23 + $0x138] sm:$0xff]   ;;  %v3016_v23 = vld [vmem:[%s3141_s23 + $0x140] sm:$0xff]  }
  0x17   : > { %v3017_v24 = vld [vmem:[%s3141_s23 + $0x48] sm:$0xff]   ;;  %v3019_v26 = vld [vmem:[%s3141_s23 + $0x50] sm:$0xff]   ;;  %v3021_v28 = vld [vmem:[%s3141_s23 + $0x58] sm:$0xff]  }
  0x18   : > { %v3018_v25 = vld [vmem:[%s3141_s23 + $0x148] sm:$0xff]   ;;  %v3020_v27 = vld [vmem:[%s3141_s23 + $0x150] sm:$0xff]   ;;  %v3022_v29 = vld [vmem:[%s3141_s23 + $0x158] sm:$0xff]  }
  0x19   : > { %v3023_v30 = vld [vmem:[%s3141_s23 + $0x60] sm:$0xff]   ;;  %v3025_v32 = vld [vmem:[%s3141_s23 + $0x68] sm:$0xff]   ;;  %v3027_v34 = vld [vmem:[%s3141_s23 + $0x70] sm:$0xff]  }
  0x1a   : > { %v3024_v31 = vld [vmem:[%s3141_s23 + $0x160] sm:$0xff]   ;;  %v3026_v33 = vld [vmem:[%s3141_s23 + $0x168] sm:$0xff]   ;;  %v3028_v35 = vld [vmem:[%s3141_s23 + $0x170] sm:$0xff]  }
  0x1b   : > { %2845 = vmatmul.mubr.msk.bf16.gmra.mrb[4].mxu0 %vm727_vm2, %v3005_v12  ;;  %v3029_v36 = vld [vmem:[%s3141_s23 + $0x78] sm:$0xff]   ;;  %v3031_v38 = vld [vmem:[%s3141_s23 + $0x80] sm:$0xff]   ;;  %v3033_v40 = vld [vmem:[%s3141_s23 + $0x88] sm:$0xff]  }
  0x1c   : > { %2909 = vmatmul.mubr.msk.bf16.gmra.mrb[4].mxu1 %vm727_vm2, %v3006_v13  ;;  %2848 = vmatprep.mubr.msk.bf16.mxu0 %vm727_vm2, %v3007_v14  ;;  %v3030_v37 = vld [vmem:[%s3141_s23 + $0x178] sm:$0xff]   ;;  %v3032_v39 = vld [vmem:[%s3141_s23 + $0x180] sm:$0xff]   ;;  %v3034_v41 = vld [vmem:[%s3141_s23 + $0x188] sm:$0xff]  }
  0x1d   : > { %2912 = vmatprep.mubr.msk.bf16.mxu1 %vm727_vm2, %v3008_v15  ;;  %v3035_v42 = vld [vmem:[%s3141_s23 + $0x90] sm:$0xff]   ;;  %v3037_v44 = vld [vmem:[%s3141_s23 + $0x98] sm:$0xff]   ;;  %v3039_v46 = vld [vmem:[%s3141_s23 + $0xa0] sm:$0xff]  }
  0x1e   : > { %v3036_v43 = vld [vmem:[%s3141_s23 + $0x190] sm:$0xff]   ;;  %v3038_v45 = vld [vmem:[%s3141_s23 + $0x198] sm:$0xff]   ;;  %v3040_v47 = vld [vmem:[%s3141_s23 + $0x1a0] sm:$0xff]  }
  0x1f   : > { %v3041_v48 = vld [vmem:[%s3141_s23 + $0xa8] sm:$0xff]   ;;  %v3043_v50 = vld [vmem:[%s3141_s23 + $0xb0] sm:$0xff]   ;;  %v3045_v52 = vld [vmem:[%s3141_s23 + $0xb8] sm:$0xff]  }
  0x20   : > { %v3042_v49 = vld [vmem:[%s3141_s23 + $0x1a8] sm:$0xff]   ;;  %v3044_v51 = vld [vmem:[%s3141_s23 + $0x1b0] sm:$0xff]   ;;  %v3046_v53 = vld [vmem:[%s3141_s23 + $0x1b8] sm:$0xff]  }
  0x21   : > { %v3047_v54 = vld [vmem:[%s3141_s23 + $0xc0] sm:$0xff]   ;;  %v3049_v56 = vld [vmem:[%s3141_s23 + $0xc8] sm:$0xff]   ;;  %v3051_v58 = vld [vmem:[%s3141_s23 + $0xd0] sm:$0xff]  }
  0x22   : > { %v3048_v55 = vld [vmem:[%s3141_s23 + $0x1c0] sm:$0xff]   ;;  %v3050_v57 = vld [vmem:[%s3141_s23 + $0x1c8] sm:$0xff]   ;;  %v3052_v59 = vld [vmem:[%s3141_s23 + $0x1d0] sm:$0xff]  }
  0x23   : > { %2849 = vmatmul.mubr.msk.bf16.gmra.mrb[8].mxu0 %vm727_vm2, %v3009_v16  ;;  %v3053_v60 = vld [vmem:[%s3141_s23 + $0xd8] sm:$0xff]   ;;  %v3055_v62 = vld [vmem:[%s3141_s23 + $0xe0] sm:$0xff]   ;;  %v3057_v0 = vld [vmem:[%s3141_s23 + $0xe8] sm:$0xff]  }
  0x24   : > { %2913 = vmatmul.mubr.msk.bf16.gmra.mrb[8].mxu1 %vm727_vm2, %v3010_v17  ;;  %2852 = vmatprep.mubr.msk.bf16.mxu0 %vm727_vm2, %v3011_v18  ;;  %v3054_v61 = vld [vmem:[%s3141_s23 + $0x1d8] sm:$0xff]   ;;  %v3056_v63 = vld [vmem:[%s3141_s23 + $0x1e0] sm:$0xff]   ;;  %v3058_v1 = vld [vmem:[%s3141_s23 + $0x1e8] sm:$0xff]  }
  0x25   : > { %2916 = vmatprep.mubr.msk.bf16.mxu1 %vm727_vm2, %v3012_v19  ;;  %v3059_v2 = vld [vmem:[%s3141_s23 + $0xf0] sm:$0xff]   ;;  %v3061_v4 = vld [vmem:[%s3141_s23 + $0xf8] sm:$0xff]   ;;  %v3274_v6 = vld [vmem:[%s3683_s2] ss:$0 sm:$0xff] }
  0x26   : > { %v3060_v3 = vld [vmem:[%s3141_s23 + $0x1f0] sm:$0xff]   ;;  %v3062_v5 = vld [vmem:[%s3141_s23 + $0x1f8] sm:$0xff]  }
  0x2b   : > { %2853 = vmatmul.mubr.msk.bf16.gmra.mrb[12].mxu0 %vm727_vm2, %v3013_v20 }
  0x2c   : > { %2917 = vmatmul.mubr.msk.bf16.gmra.mrb[12].mxu1 %vm727_vm2, %v3014_v21  ;;  %2856 = vmatprep.mubr.msk.bf16.mxu0 %vm727_vm2, %v3015_v22 }
  0x2d   : > { %2920 = vmatprep.mubr.msk.bf16.mxu1 %vm727_vm2, %v3016_v23 }
  0x33   : > { %2857 = vmatmul.mubr.msk.bf16.gmra.mrb[16].mxu0 %vm727_vm2, %v3017_v24 }
  0x34   : > { %2921 = vmatmul.mubr.msk.bf16.gmra.mrb[16].mxu1 %vm727_vm2, %v3018_v25  ;;  %2860 = vmatprep.mubr.msk.bf16.mxu0 %vm727_vm2, %v3019_v26 }
  0x35   : > { %2924 = vmatprep.mubr.msk.bf16.mxu1 %vm727_vm2, %v3020_v27 }
  0x3b   : > { %2861 = vmatmul.mubr.msk.bf16.gmra.mrb[20].mxu0 %vm727_vm2, %v3021_v28 }
  0x3c   : > { %2925 = vmatmul.mubr.msk.bf16.gmra.mrb[20].mxu1 %vm727_vm2, %v3022_v29  ;;  %2864 = vmatprep.mubr.msk.bf16.mxu0 %vm727_vm2, %v3023_v30 }
  0x3d   : > { %2928 = vmatprep.mubr.msk.bf16.mxu1 %vm727_vm2, %v3024_v31 }
  0x43   : > { %2865 = vmatmul.mubr.msk.bf16.gmra.mrb[24].mxu0 %vm727_vm2, %v3025_v32 }
  0x44   : > { %2929 = vmatmul.mubr.msk.bf16.gmra.mrb[24].mxu1 %vm727_vm2, %v3026_v33  ;;  %2868 = vmatprep.mubr.msk.bf16.mxu0 %vm727_vm2, %v3027_v34 }
  0x45   : > { %2932 = vmatprep.mubr.msk.bf16.mxu1 %vm727_vm2, %v3028_v35 }
  0x4b   : > { %2869 = vmatmul.mubr.msk.bf16.gmra.mrb[28].mxu0 %vm727_vm2, %v3029_v36 }
  0x4c   : > { %2933 = vmatmul.mubr.msk.bf16.gmra.mrb[28].mxu1 %vm727_vm2, %v3030_v37  ;;  %2872 = vmatprep.mubr.msk.bf16.mxu0 %vm727_vm2, %v3031_v38 }
  0x4d   : > { %2936 = vmatprep.mubr.msk.bf16.mxu1 %vm727_vm2, %v3032_v39 }
  0x53   : > { %2873 = vmatmul.mubr.msk.bf16.gmra.mrb[32].mxu0 %vm727_vm2, %v3033_v40 }
  0x54   : > { %2937 = vmatmul.mubr.msk.bf16.gmra.mrb[32].mxu1 %vm727_vm2, %v3034_v41  ;;  %2876 = vmatprep.mubr.msk.bf16.mxu0 %vm727_vm2, %v3035_v42 }
  0x55   : > { %2940 = vmatprep.mubr.msk.bf16.mxu1 %vm727_vm2, %v3036_v43 }
  0x5b   : > { %2877 = vmatmul.mubr.msk.bf16.gmra.mrb[36].mxu0 %vm727_vm2, %v3037_v44 }
  0x5c   : > { %2941 = vmatmul.mubr.msk.bf16.gmra.mrb[36].mxu1 %vm727_vm2, %v3038_v45  ;;  %2880 = vmatprep.mubr.msk.bf16.mxu0 %vm727_vm2, %v3039_v46 }
  0x5d   : > { %2944 = vmatprep.mubr.msk.bf16.mxu1 %vm727_vm2, %v3040_v47 }
  0x63   : > { %2881 = vmatmul.mubr.msk.bf16.gmra.mrb[40].mxu0 %vm727_vm2, %v3041_v48 }
  0x64   : > { %2945 = vmatmul.mubr.msk.bf16.gmra.mrb[40].mxu1 %vm727_vm2, %v3042_v49  ;;  %2884 = vmatprep.mubr.msk.bf16.mxu0 %vm727_vm2, %v3043_v50 }
  0x65   : > { %2948 = vmatprep.mubr.msk.bf16.mxu1 %vm727_vm2, %v3044_v51 }
  0x6b   : > { %2885 = vmatmul.mubr.msk.bf16.gmra.mrb[44].mxu0 %vm727_vm2, %v3045_v52 }
  0x6c   : > { %2949 = vmatmul.mubr.msk.bf16.gmra.mrb[44].mxu1 %vm727_vm2, %v3046_v53  ;;  %2888 = vmatprep.mubr.msk.bf16.mxu0 %vm727_vm2, %v3047_v54 }
  0x6d   : > { %2952 = vmatprep.mubr.msk.bf16.mxu1 %vm727_vm2, %v3048_v55 }
  0x73   : > { %2889 = vmatmul.mubr.msk.bf16.gmra.mrb[48].mxu0 %vm727_vm2, %v3049_v56 }
  0x74   : > { %2953 = vmatmul.mubr.msk.bf16.gmra.mrb[48].mxu1 %vm727_vm2, %v3050_v57  ;;  %2892 = vmatprep.mubr.msk.bf16.mxu0 %vm727_vm2, %v3051_v58 }
  0x75   : > { %2956 = vmatprep.mubr.msk.bf16.mxu1 %vm727_vm2, %v3052_v59 }
  0x7b   : > { %2893 = vmatmul.mubr.msk.bf16.gmra.mrb[52].mxu0 %vm727_vm2, %v3053_v60 }
  0x7c   : > { %2957 = vmatmul.mubr.msk.bf16.gmra.mrb[52].mxu1 %vm727_vm2, %v3054_v61  ;;  %2896 = vmatprep.mubr.msk.bf16.mxu0 %vm727_vm2, %v3055_v62 }
  0x7d   : > { %2960 = vmatprep.mubr.msk.bf16.mxu1 %vm727_vm2, %v3056_v63 }
  0x83   : > { %2897 = vmatmul.mubr.msk.bf16.gmra.mrb[56].mxu0 %vm727_vm2, %v3057_v0 }
  0x84   : > { %2961 = vmatmul.mubr.msk.bf16.gmra.mrb[56].mxu1 %vm727_vm2, %v3058_v1  ;;  %2900 = vmatprep.mubr.msk.bf16.mxu0 %vm727_vm2, %v3059_v2 }
  0x85   : > { %2964 = vmatprep.mubr.msk.bf16.mxu1 %vm727_vm2, %v3060_v3 }
  0x8b   : > { %2901 = vmatmul.mubr.msk.bf16.gmra.mrb[60].mxu0 %vm727_vm2, %v3061_v4 }
  0x8c   : > { %2965 = vmatmul.mubr.msk.bf16.gmra.mrb[60].mxu1 %vm727_vm2, %v3062_v5 }
  0xe6   : > { %v2842_v7 = vpop.f32.mrb[0].mxu0 }
  0xe7   : > { %v970_v8 = vadd.f32 %v2842_v7, %v3274_v6  ;;  %v2906_v9 = vpop.f32.mrb[0].mxu1  ;;  %v961_v10 = vpop.f32.mrb[1].mxu0 }
  0xe8   : > { %v1226_v11 = vadd.f32 %v2906_v9, %v3274_v6  ;;  %v962_v12 = vadd.f32 %v3274_v6, %v961_v10  ;;  %v1217_v13 = vpop.f32.mrb[1].mxu1  ;;  %v2843_v14 = vpop.f32.mrb[2].mxu0 }
  0xe9   : > { %v1474_v15 = vmax.f32 %v970_v8, 0.0  ;;  %v1218_v16 = vadd.f32 %v3274_v6, %v1217_v13  ;;  %v973_v17 = vadd.f32 %v2843_v14, %v3274_v6  ;;  %v2907_v18 = vpop.f32.mrb[2].mxu1  ;;  %v964_v19 = vpop.f32.mrb[3].mxu0 }
  0xea   : > { %v1538_v20 = vmax.f32 %v1226_v11, 0.0  ;;  %v1472_v21 = vmax.f32 %v962_v12, 0.0  ;;  %v1229_v22 = vadd.f32 %v2907_v18, %v3274_v6  ;;  %v965_v23 = vadd.f32 %v3274_v6, %v964_v19  ;;  %v1220_v24 = vpop.f32.mrb[3].mxu1 }
  0xeb   : > { %v2644_v25 = vpack.c.bf16 %v1474_v15, %v1474_v15  ;;  %v1536_v26 = vmax.f32 %v1218_v16, 0.0  ;;  %v1475_v27 = vmax.f32 %v973_v17, 0.0  ;;  %v1221_v28 = vadd.f32 %v3274_v6, %v1220_v24 }
  0xec   : > { %v2708_v29 = vpack.c.bf16 %v1538_v20, %v1538_v20  ;;  %v2642_v30 = vpack.c.bf16 %v1472_v21, %v1472_v21  ;;  %v1539_v31 = vmax.f32 %v1229_v22, 0.0  ;;  %v1473_v32 = vmax.f32 %v965_v23, 0.0 }
  0xed   : > { %2115 = vst.msk [vmem:[%s3286_s28 + $0x8] sm:$0xf] %vm2112_vm3, %v2644_v25  ;;  %v2706_v33 = vpack.c.bf16 %v1536_v26, %v1536_v26  ;;  %v2645_v34 = vpack.c.bf16 %v1475_v27, %v1475_v27  ;;  %v1537_v35 = vmax.f32 %v1221_v28, 0.0 }
  0xee   : > { %2179 = vst.msk [vmem:[%s3286_s28 + $0x108] sm:$0xf] %vm2112_vm3, %v2708_v29  ;;  %2113 = vst.msk [vmem:[%s3286_s28] sm:$0xf] %vm2112_vm3, %v2642_v30  ;;  %v2709_v36 = vpack.c.bf16 %v1539_v31, %v1539_v31  ;;  %v2643_v37 = vpack.c.bf16 %v1473_v32, %v1473_v32  ;;  %v2846_v38 = vpop.f32.mrb[4].mxu0 }
  0xef   : > { %2177 = vst.msk [vmem:[%s3286_s28 + $0x100] sm:$0xf] %vm2112_vm3, %v2706_v33  ;;  %2116 = vst.msk [vmem:[%s3286_s28 + $0xc] sm:$0xf] %vm2112_vm3, %v2645_v34  ;;  %v2707_v39 = vpack.c.bf16 %v1537_v35, %v1537_v35  ;;  %v986_v40 = vadd.f32 %v2846_v38, %v3274_v6  ;;  %v2910_v41 = vpop.f32.mrb[4].mxu1  ;;  %v977_v42 = vpop.f32.mrb[5].mxu0 }
  0xf0   : > { %2180 = vst.msk [vmem:[%s3286_s28 + $0x10c] sm:$0xf] %vm2112_vm3, %v2709_v36  ;;  %2114 = vst.msk [vmem:[%s3286_s28 + $0x4] sm:$0xf] %vm2112_vm3, %v2643_v37  ;;  %v1242_v43 = vadd.f32 %v2910_v41, %v3274_v6  ;;  %v978_v44 = vadd.f32 %v3274_v6, %v977_v42  ;;  %v1233_v45 = vpop.f32.mrb[5].mxu1  ;;  %v2847_v46 = vpop.f32.mrb[6].mxu0 }
  0xf1   : > { %2178 = vst.msk [vmem:[%s3286_s28 + $0x104] sm:$0xf] %vm2112_vm3, %v2707_v39  ;;  %v1478_v47 = vmax.f32 %v986_v40, 0.0  ;;  %v1234_v48 = vadd.f32 %v3274_v6, %v1233_v45  ;;  %v989_v49 = vadd.f32 %v2847_v46, %v3274_v6  ;;  %v2911_v50 = vpop.f32.mrb[6].mxu1  ;;  %v980_v51 = vpop.f32.mrb[7].mxu0 }
  0xf2   : > { %v1542_v52 = vmax.f32 %v1242_v43, 0.0  ;;  %v1476_v53 = vmax.f32 %v978_v44, 0.0  ;;  %v1245_v54 = vadd.f32 %v2911_v50, %v3274_v6  ;;  %v981_v55 = vadd.f32 %v3274_v6, %v980_v51  ;;  %v1236_v56 = vpop.f32.mrb[7].mxu1 }
  0xf3   : > { %v2648_v57 = vpack.c.bf16 %v1478_v47, %v1478_v47  ;;  %v1540_v58 = vmax.f32 %v1234_v48, 0.0  ;;  %v1479_v59 = vmax.f32 %v989_v49, 0.0  ;;  %v1237_v60 = vadd.f32 %v3274_v6, %v1236_v56 }
  0xf4   : > { %v2712_v61 = vpack.c.bf16 %v1542_v52, %v1542_v52  ;;  %v2646_v62 = vpack.c.bf16 %v1476_v53, %v1476_v53  ;;  %v1543_v63 = vmax.f32 %v1245_v54, 0.0  ;;  %v1477_v0 = vmax.f32 %v981_v55, 0.0 }
  0xf5   : > { %2119 = vst.msk [vmem:[%s3286_s28 + $0x18] sm:$0xf] %vm2112_vm3, %v2648_v57  ;;  %v2710_v1 = vpack.c.bf16 %v1540_v58, %v1540_v58  ;;  %v2649_v2 = vpack.c.bf16 %v1479_v59, %v1479_v59  ;;  %v1541_v3 = vmax.f32 %v1237_v60, 0.0 }
  0xf6   : > { %2183 = vst.msk [vmem:[%s3286_s28 + $0x118] sm:$0xf] %vm2112_vm3, %v2712_v61  ;;  %2117 = vst.msk [vmem:[%s3286_s28 + $0x10] sm:$0xf] %vm2112_vm3, %v2646_v62  ;;  %v2713_v4 = vpack.c.bf16 %v1543_v63, %v1543_v63  ;;  %v2647_v5 = vpack.c.bf16 %v1477_v0, %v1477_v0  ;;  %v2850_v7 = vpop.f32.mrb[8].mxu0 }
  0xf7   : > { %2181 = vst.msk [vmem:[%s3286_s28 + $0x110] sm:$0xf] %vm2112_vm3, %v2710_v1  ;;  %2120 = vst.msk [vmem:[%s3286_s28 + $0x1c] sm:$0xf] %vm2112_vm3, %v2649_v2  ;;  %v2711_v8 = vpack.c.bf16 %v1541_v3, %v1541_v3  ;;  %v1002_v9 = vadd.f32 %v2850_v7, %v3274_v6  ;;  %v2914_v10 = vpop.f32.mrb[8].mxu1  ;;  %v993_v11 = vpop.f32.mrb[9].mxu0 }
  0xf8   : > { %2184 = vst.msk [vmem:[%s3286_s28 + $0x11c] sm:$0xf] %vm2112_vm3, %v2713_v4  ;;  %2118 = vst.msk [vmem:[%s3286_s28 + $0x14] sm:$0xf] %vm2112_vm3, %v2647_v5  ;;  %v1258_v12 = vadd.f32 %v2914_v10, %v3274_v6  ;;  %v994_v13 = vadd.f32 %v3274_v6, %v993_v11  ;;  %v1249_v14 = vpop.f32.mrb[9].mxu1  ;;  %v2851_v15 = vpop.f32.mrb[10].mxu0 }
  0xf9   : > { %2182 = vst.msk [vmem:[%s3286_s28 + $0x114] sm:$0xf] %vm2112_vm3, %v2711_v8  ;;  %v1482_v16 = vmax.f32 %v1002_v9, 0.0  ;;  %v1250_v17 = vadd.f32 %v3274_v6, %v1249_v14  ;;  %v1005_v18 = vadd.f32 %v2851_v15, %v3274_v6  ;;  %v2915_v19 = vpop.f32.mrb[10].mxu1  ;;  %v996_v20 = vpop.f32.mrb[11].mxu0 }
  0xfa   : > { %v1546_v21 = vmax.f32 %v1258_v12, 0.0  ;;  %v1480_v22 = vmax.f32 %v994_v13, 0.0  ;;  %v1261_v23 = vadd.f32 %v2915_v19, %v3274_v6  ;;  %v997_v24 = vadd.f32 %v3274_v6, %v996_v20  ;;  %v1252_v25 = vpop.f32.mrb[11].mxu1 }
  0xfb   : > { %v2652_v26 = vpack.c.bf16 %v1482_v16, %v1482_v16  ;;  %v1544_v27 = vmax.f32 %v1250_v17, 0.0  ;;  %v1483_v28 = vmax.f32 %v1005_v18, 0.0  ;;  %v1253_v29 = vadd.f32 %v3274_v6, %v1252_v25 }
  0xfc   : > { %v2716_v30 = vpack.c.bf16 %v1546_v21, %v1546_v21  ;;  %v2650_v31 = vpack.c.bf16 %v1480_v22, %v1480_v22  ;;  %v1547_v32 = vmax.f32 %v1261_v23, 0.0  ;;  %v1481_v33 = vmax.f32 %v997_v24, 0.0 }
  0xfd   : > { %2123 = vst.msk [vmem:[%s3286_s28 + $0x28] sm:$0xf] %vm2112_vm3, %v2652_v26  ;;  %v2714_v34 = vpack.c.bf16 %v1544_v27, %v1544_v27  ;;  %v2653_v35 = vpack.c.bf16 %v1483_v28, %v1483_v28  ;;  %v1545_v36 = vmax.f32 %v1253_v29, 0.0 }
  0xfe   : > { %2187 = vst.msk [vmem:[%s3286_s28 + $0x128] sm:$0xf] %vm2112_vm3, %v2716_v30  ;;  %2121 = vst.msk [vmem:[%s3286_s28 + $0x20] sm:$0xf] %vm2112_vm3, %v2650_v31  ;;  %v2717_v37 = vpack.c.bf16 %v1547_v32, %v1547_v32  ;;  %v2651_v38 = vpack.c.bf16 %v1481_v33, %v1481_v33  ;;  %v2854_v39 = vpop.f32.mrb[12].mxu0 }
  0xff   : > { %2185 = vst.msk [vmem:[%s3286_s28 + $0x120] sm:$0xf] %vm2112_vm3, %v2714_v34  ;;  %2124 = vst.msk [vmem:[%s3286_s28 + $0x2c] sm:$0xf] %vm2112_vm3, %v2653_v35  ;;  %v2715_v40 = vpack.c.bf16 %v1545_v36, %v1545_v36  ;;  %v1018_v41 = vadd.f32 %v2854_v39, %v3274_v6  ;;  %v2918_v42 = vpop.f32.mrb[12].mxu1  ;;  %v1009_v43 = vpop.f32.mrb[13].mxu0 }
 0x100   : > { %2188 = vst.msk [vmem:[%s3286_s28 + $0x12c] sm:$0xf] %vm2112_vm3, %v2717_v37  ;;  %2122 = vst.msk [vmem:[%s3286_s28 + $0x24] sm:$0xf] %vm2112_vm3, %v2651_v38  ;;  %v1274_v44 = vadd.f32 %v2918_v42, %v3274_v6  ;;  %v1010_v45 = vadd.f32 %v3274_v6, %v1009_v43  ;;  %v1265_v46 = vpop.f32.mrb[13].mxu1  ;;  %v2855_v47 = vpop.f32.mrb[14].mxu0 }
 0x101   : > { %2186 = vst.msk [vmem:[%s3286_s28 + $0x124] sm:$0xf] %vm2112_vm3, %v2715_v40  ;;  %v1486_v48 = vmax.f32 %v1018_v41, 0.0  ;;  %v1266_v49 = vadd.f32 %v3274_v6, %v1265_v46  ;;  %v1021_v50 = vadd.f32 %v2855_v47, %v3274_v6  ;;  %v2919_v51 = vpop.f32.mrb[14].mxu1  ;;  %v1012_v52 = vpop.f32.mrb[15].mxu0 }
 0x102   : > { %v1550_v53 = vmax.f32 %v1274_v44, 0.0  ;;  %v1484_v54 = vmax.f32 %v1010_v45, 0.0  ;;  %v1277_v55 = vadd.f32 %v2919_v51, %v3274_v6  ;;  %v1013_v56 = vadd.f32 %v3274_v6, %v1012_v52  ;;  %v1268_v57 = vpop.f32.mrb[15].mxu1 }
 0x103   : > { %v2656_v58 = vpack.c.bf16 %v1486_v48, %v1486_v48  ;;  %v1548_v59 = vmax.f32 %v1266_v49, 0.0  ;;  %v1487_v60 = vmax.f32 %v1021_v50, 0.0  ;;  %v1269_v61 = vadd.f32 %v3274_v6, %v1268_v57 }
 0x104   : > { %v2720_v62 = vpack.c.bf16 %v1550_v53, %v1550_v53  ;;  %v2654_v63 = vpack.c.bf16 %v1484_v54, %v1484_v54  ;;  %v1551_v0 = vmax.f32 %v1277_v55, 0.0  ;;  %v1485_v1 = vmax.f32 %v1013_v56, 0.0 }
 0x105   : > { %2127 = vst.msk [vmem:[%s3286_s28 + $0x38] sm:$0xf] %vm2112_vm3, %v2656_v58  ;;  %v2718_v2 = vpack.c.bf16 %v1548_v59, %v1548_v59  ;;  %v2657_v3 = vpack.c.bf16 %v1487_v60, %v1487_v60  ;;  %v1549_v4 = vmax.f32 %v1269_v61, 0.0 }
 0x106   : > { %2191 = vst.msk [vmem:[%s3286_s28 + $0x138] sm:$0xf] %vm2112_vm3, %v2720_v62  ;;  %2125 = vst.msk [vmem:[%s3286_s28 + $0x30] sm:$0xf] %vm2112_vm3, %v2654_v63  ;;  %v2721_v5 = vpack.c.bf16 %v1551_v0, %v1551_v0  ;;  %v2655_v7 = vpack.c.bf16 %v1485_v1, %v1485_v1  ;;  %v2858_v8 = vpop.f32.mrb[16].mxu0 }
 0x107   : > { %2189 = vst.msk [vmem:[%s3286_s28 + $0x130] sm:$0xf] %vm2112_vm3, %v2718_v2  ;;  %2128 = vst.msk [vmem:[%s3286_s28 + $0x3c] sm:$0xf] %vm2112_vm3, %v2657_v3  ;;  %v2719_v9 = vpack.c.bf16 %v1549_v4, %v1549_v4  ;;  %v1034_v10 = vadd.f32 %v2858_v8, %v3274_v6  ;;  %v2922_v11 = vpop.f32.mrb[16].mxu1  ;;  %v1025_v12 = vpop.f32.mrb[17].mxu0 }
 0x108   : > { %2192 = vst.msk [vmem:[%s3286_s28 + $0x13c] sm:$0xf] %vm2112_vm3, %v2721_v5  ;;  %2126 = vst.msk [vmem:[%s3286_s28 + $0x34] sm:$0xf] %vm2112_vm3, %v2655_v7  ;;  %v1290_v13 = vadd.f32 %v2922_v11, %v3274_v6  ;;  %v1026_v14 = vadd.f32 %v3274_v6, %v1025_v12  ;;  %v1281_v15 = vpop.f32.mrb[17].mxu1  ;;  %v2859_v16 = vpop.f32.mrb[18].mxu0 }
 0x109   : > { %2190 = vst.msk [vmem:[%s3286_s28 + $0x134] sm:$0xf] %vm2112_vm3, %v2719_v9  ;;  %v1490_v17 = vmax.f32 %v1034_v10, 0.0  ;;  %v1282_v18 = vadd.f32 %v3274_v6, %v1281_v15  ;;  %v1037_v19 = vadd.f32 %v2859_v16, %v3274_v6  ;;  %v2923_v20 = vpop.f32.mrb[18].mxu1  ;;  %v1028_v21 = vpop.f32.mrb[19].mxu0 }
 0x10a   : > { %v1554_v22 = vmax.f32 %v1290_v13, 0.0  ;;  %v1488_v23 = vmax.f32 %v1026_v14, 0.0  ;;  %v1293_v24 = vadd.f32 %v2923_v20, %v3274_v6  ;;  %v1029_v25 = vadd.f32 %v3274_v6, %v1028_v21  ;;  %v1284_v26 = vpop.f32.mrb[19].mxu1 }
 0x10b   : > { %v2660_v27 = vpack.c.bf16 %v1490_v17, %v1490_v17  ;;  %v1552_v28 = vmax.f32 %v1282_v18, 0.0  ;;  %v1491_v29 = vmax.f32 %v1037_v19, 0.0  ;;  %v1285_v30 = vadd.f32 %v3274_v6, %v1284_v26 }
 0x10c   : > { %v2724_v31 = vpack.c.bf16 %v1554_v22, %v1554_v22  ;;  %v2658_v32 = vpack.c.bf16 %v1488_v23, %v1488_v23  ;;  %v1555_v33 = vmax.f32 %v1293_v24, 0.0  ;;  %v1489_v34 = vmax.f32 %v1029_v25, 0.0 }
 0x10d   : > { %2131 = vst.msk [vmem:[%s3286_s28 + $0x48] sm:$0xf] %vm2112_vm3, %v2660_v27  ;;  %v2722_v35 = vpack.c.bf16 %v1552_v28, %v1552_v28  ;;  %v2661_v36 = vpack.c.bf16 %v1491_v29, %v1491_v29  ;;  %v1553_v37 = vmax.f32 %v1285_v30, 0.0 }
 0x10e   : > { %2195 = vst.msk [vmem:[%s3286_s28 + $0x148] sm:$0xf] %vm2112_vm3, %v2724_v31  ;;  %2129 = vst.msk [vmem:[%s3286_s28 + $0x40] sm:$0xf] %vm2112_vm3, %v2658_v32  ;;  %v2725_v38 = vpack.c.bf16 %v1555_v33, %v1555_v33  ;;  %v2659_v39 = vpack.c.bf16 %v1489_v34, %v1489_v34  ;;  %v2862_v40 = vpop.f32.mrb[20].mxu0 }
 0x10f   : > { %2193 = vst.msk [vmem:[%s3286_s28 + $0x140] sm:$0xf] %vm2112_vm3, %v2722_v35  ;;  %2132 = vst.msk [vmem:[%s3286_s28 + $0x4c] sm:$0xf] %vm2112_vm3, %v2661_v36  ;;  %v2723_v41 = vpack.c.bf16 %v1553_v37, %v1553_v37  ;;  %v1050_v42 = vadd.f32 %v2862_v40, %v3274_v6  ;;  %v2926_v43 = vpop.f32.mrb[20].mxu1  ;;  %v1041_v44 = vpop.f32.mrb[21].mxu0 }
 0x110   : > { %2196 = vst.msk [vmem:[%s3286_s28 + $0x14c] sm:$0xf] %vm2112_vm3, %v2725_v38  ;;  %2130 = vst.msk [vmem:[%s3286_s28 + $0x44] sm:$0xf] %vm2112_vm3, %v2659_v39  ;;  %v1306_v45 = vadd.f32 %v2926_v43, %v3274_v6  ;;  %v1042_v46 = vadd.f32 %v3274_v6, %v1041_v44  ;;  %v1297_v47 = vpop.f32.mrb[21].mxu1  ;;  %v2863_v48 = vpop.f32.mrb[22].mxu0 }
 0x111   : > { %2194 = vst.msk [vmem:[%s3286_s28 + $0x144] sm:$0xf] %vm2112_vm3, %v2723_v41  ;;  %v1494_v49 = vmax.f32 %v1050_v42, 0.0  ;;  %v1298_v50 = vadd.f32 %v3274_v6, %v1297_v47  ;;  %v1053_v51 = vadd.f32 %v2863_v48, %v3274_v6  ;;  %v2927_v52 = vpop.f32.mrb[22].mxu1  ;;  %v1044_v53 = vpop.f32.mrb[23].mxu0 }
 0x112   : > { %v1558_v54 = vmax.f32 %v1306_v45, 0.0  ;;  %v1492_v55 = vmax.f32 %v1042_v46, 0.0  ;;  %v1309_v56 = vadd.f32 %v2927_v52, %v3274_v6  ;;  %v1045_v57 = vadd.f32 %v3274_v6, %v1044_v53  ;;  %v1300_v58 = vpop.f32.mrb[23].mxu1 }
 0x113   : > { %v2664_v59 = vpack.c.bf16 %v1494_v49, %v1494_v49  ;;  %v1556_v60 = vmax.f32 %v1298_v50, 0.0  ;;  %v1495_v61 = vmax.f32 %v1053_v51, 0.0  ;;  %v1301_v62 = vadd.f32 %v3274_v6, %v1300_v58 }
 0x114   : > { %v2728_v63 = vpack.c.bf16 %v1558_v54, %v1558_v54  ;;  %v2662_v0 = vpack.c.bf16 %v1492_v55, %v1492_v55  ;;  %v1559_v1 = vmax.f32 %v1309_v56, 0.0  ;;  %v1493_v2 = vmax.f32 %v1045_v57, 0.0 }
 0x115   : > { %2135 = vst.msk [vmem:[%s3286_s28 + $0x58] sm:$0xf] %vm2112_vm3, %v2664_v59  ;;  %v2726_v3 = vpack.c.bf16 %v1556_v60, %v1556_v60  ;;  %v2665_v4 = vpack.c.bf16 %v1495_v61, %v1495_v61  ;;  %v1557_v5 = vmax.f32 %v1301_v62, 0.0 }
 0x116   : > { %2199 = vst.msk [vmem:[%s3286_s28 + $0x158] sm:$0xf] %vm2112_vm3, %v2728_v63  ;;  %2133 = vst.msk [vmem:[%s3286_s28 + $0x50] sm:$0xf] %vm2112_vm3, %v2662_v0  ;;  %v2729_v7 = vpack.c.bf16 %v1559_v1, %v1559_v1  ;;  %v2663_v8 = vpack.c.bf16 %v1493_v2, %v1493_v2  ;;  %v2866_v9 = vpop.f32.mrb[24].mxu0 }
 0x117   : > { %2197 = vst.msk [vmem:[%s3286_s28 + $0x150] sm:$0xf] %vm2112_vm3, %v2726_v3  ;;  %2136 = vst.msk [vmem:[%s3286_s28 + $0x5c] sm:$0xf] %vm2112_vm3, %v2665_v4  ;;  %v2727_v10 = vpack.c.bf16 %v1557_v5, %v1557_v5  ;;  %v1066_v11 = vadd.f32 %v2866_v9, %v3274_v6  ;;  %v2930_v12 = vpop.f32.mrb[24].mxu1  ;;  %v1057_v13 = vpop.f32.mrb[25].mxu0 }
 0x118   : > { %2200 = vst.msk [vmem:[%s3286_s28 + $0x15c] sm:$0xf] %vm2112_vm3, %v2729_v7  ;;  %2134 = vst.msk [vmem:[%s3286_s28 + $0x54] sm:$0xf] %vm2112_vm3, %v2663_v8  ;;  %v1322_v14 = vadd.f32 %v2930_v12, %v3274_v6  ;;  %v1058_v15 = vadd.f32 %v3274_v6, %v1057_v13  ;;  %v1313_v16 = vpop.f32.mrb[25].mxu1  ;;  %v2867_v17 = vpop.f32.mrb[26].mxu0 }
 0x119   : > { %2198 = vst.msk [vmem:[%s3286_s28 + $0x154] sm:$0xf] %vm2112_vm3, %v2727_v10  ;;  %v1498_v18 = vmax.f32 %v1066_v11, 0.0  ;;  %v1314_v19 = vadd.f32 %v3274_v6, %v1313_v16  ;;  %v1069_v20 = vadd.f32 %v2867_v17, %v3274_v6  ;;  %v2931_v21 = vpop.f32.mrb[26].mxu1  ;;  %v1060_v22 = vpop.f32.mrb[27].mxu0 }
 0x11a   : > { %v1562_v23 = vmax.f32 %v1322_v14, 0.0  ;;  %v1496_v24 = vmax.f32 %v1058_v15, 0.0  ;;  %v1325_v25 = vadd.f32 %v2931_v21, %v3274_v6  ;;  %v1061_v26 = vadd.f32 %v3274_v6, %v1060_v22  ;;  %v1316_v27 = vpop.f32.mrb[27].mxu1 }
 0x11b   : > { %v2668_v28 = vpack.c.bf16 %v1498_v18, %v1498_v18  ;;  %v1560_v29 = vmax.f32 %v1314_v19, 0.0  ;;  %v1499_v30 = vmax.f32 %v1069_v20, 0.0  ;;  %v1317_v31 = vadd.f32 %v3274_v6, %v1316_v27 }
 0x11c   : > { %v2732_v32 = vpack.c.bf16 %v1562_v23, %v1562_v23  ;;  %v2666_v33 = vpack.c.bf16 %v1496_v24, %v1496_v24  ;;  %v1563_v34 = vmax.f32 %v1325_v25, 0.0  ;;  %v1497_v35 = vmax.f32 %v1061_v26, 0.0 }
 0x11d   : > { %2139 = vst.msk [vmem:[%s3286_s28 + $0x68] sm:$0xf] %vm2112_vm3, %v2668_v28  ;;  %v2730_v36 = vpack.c.bf16 %v1560_v29, %v1560_v29  ;;  %v2669_v37 = vpack.c.bf16 %v1499_v30, %v1499_v30  ;;  %v1561_v38 = vmax.f32 %v1317_v31, 0.0 }
 0x11e   : > { %2203 = vst.msk [vmem:[%s3286_s28 + $0x168] sm:$0xf] %vm2112_vm3, %v2732_v32  ;;  %2137 = vst.msk [vmem:[%s3286_s28 + $0x60] sm:$0xf] %vm2112_vm3, %v2666_v33  ;;  %v2733_v39 = vpack.c.bf16 %v1563_v34, %v1563_v34  ;;  %v2667_v40 = vpack.c.bf16 %v1497_v35, %v1497_v35  ;;  %v2870_v41 = vpop.f32.mrb[28].mxu0 }
 0x11f   : > { %2201 = vst.msk [vmem:[%s3286_s28 + $0x160] sm:$0xf] %vm2112_vm3, %v2730_v36  ;;  %2140 = vst.msk [vmem:[%s3286_s28 + $0x6c] sm:$0xf] %vm2112_vm3, %v2669_v37  ;;  %v2731_v42 = vpack.c.bf16 %v1561_v38, %v1561_v38  ;;  %v1082_v43 = vadd.f32 %v2870_v41, %v3274_v6  ;;  %v2934_v44 = vpop.f32.mrb[28].mxu1  ;;  %v1073_v45 = vpop.f32.mrb[29].mxu0 }
 0x120   : > { %2204 = vst.msk [vmem:[%s3286_s28 + $0x16c] sm:$0xf] %vm2112_vm3, %v2733_v39  ;;  %2138 = vst.msk [vmem:[%s3286_s28 + $0x64] sm:$0xf] %vm2112_vm3, %v2667_v40  ;;  %v1338_v46 = vadd.f32 %v2934_v44, %v3274_v6  ;;  %v1074_v47 = vadd.f32 %v3274_v6, %v1073_v45  ;;  %v1329_v48 = vpop.f32.mrb[29].mxu1  ;;  %v2871_v49 = vpop.f32.mrb[30].mxu0 }
 0x121   : > { %2202 = vst.msk [vmem:[%s3286_s28 + $0x164] sm:$0xf] %vm2112_vm3, %v2731_v42  ;;  %v1502_v50 = vmax.f32 %v1082_v43, 0.0  ;;  %v1330_v51 = vadd.f32 %v3274_v6, %v1329_v48  ;;  %v1085_v52 = vadd.f32 %v2871_v49, %v3274_v6  ;;  %v2935_v53 = vpop.f32.mrb[30].mxu1  ;;  %v1076_v54 = vpop.f32.mrb[31].mxu0 }
 0x122   : > { %v1566_v55 = vmax.f32 %v1338_v46, 0.0  ;;  %v1500_v56 = vmax.f32 %v1074_v47, 0.0  ;;  %v1341_v57 = vadd.f32 %v2935_v53, %v3274_v6  ;;  %v1077_v58 = vadd.f32 %v3274_v6, %v1076_v54  ;;  %v1332_v59 = vpop.f32.mrb[31].mxu1 }
 0x123   : > { %v2672_v60 = vpack.c.bf16 %v1502_v50, %v1502_v50  ;;  %v1564_v61 = vmax.f32 %v1330_v51, 0.0  ;;  %v1503_v62 = vmax.f32 %v1085_v52, 0.0  ;;  %v1333_v63 = vadd.f32 %v3274_v6, %v1332_v59 }
 0x124   : > { %v2736_v0 = vpack.c.bf16 %v1566_v55, %v1566_v55  ;;  %v2670_v1 = vpack.c.bf16 %v1500_v56, %v1500_v56  ;;  %v1567_v2 = vmax.f32 %v1341_v57, 0.0  ;;  %v1501_v3 = vmax.f32 %v1077_v58, 0.0 }
 0x125   : > { %2143 = vst.msk [vmem:[%s3286_s28 + $0x78] sm:$0xf] %vm2112_vm3, %v2672_v60  ;;  %v2734_v4 = vpack.c.bf16 %v1564_v61, %v1564_v61  ;;  %v2673_v5 = vpack.c.bf16 %v1503_v62, %v1503_v62  ;;  %v1565_v7 = vmax.f32 %v1333_v63, 0.0 }
 0x126   : > { %2207 = vst.msk [vmem:[%s3286_s28 + $0x178] sm:$0xf] %vm2112_vm3, %v2736_v0  ;;  %2141 = vst.msk [vmem:[%s3286_s28 + $0x70] sm:$0xf] %vm2112_vm3, %v2670_v1  ;;  %v2737_v8 = vpack.c.bf16 %v1567_v2, %v1567_v2  ;;  %v2671_v9 = vpack.c.bf16 %v1501_v3, %v1501_v3  ;;  %v2874_v10 = vpop.f32.mrb[32].mxu0 }
 0x127   : > { %2205 = vst.msk [vmem:[%s3286_s28 + $0x170] sm:$0xf] %vm2112_vm3, %v2734_v4  ;;  %2144 = vst.msk [vmem:[%s3286_s28 + $0x7c] sm:$0xf] %vm2112_vm3, %v2673_v5  ;;  %v2735_v11 = vpack.c.bf16 %v1565_v7, %v1565_v7  ;;  %v1098_v12 = vadd.f32 %v2874_v10, %v3274_v6  ;;  %v2938_v13 = vpop.f32.mrb[32].mxu1  ;;  %v1089_v14 = vpop.f32.mrb[33].mxu0 }
 0x128   : > { %2208 = vst.msk [vmem:[%s3286_s28 + $0x17c] sm:$0xf] %vm2112_vm3, %v2737_v8  ;;  %2142 = vst.msk [vmem:[%s3286_s28 + $0x74] sm:$0xf] %vm2112_vm3, %v2671_v9  ;;  %v1354_v15 = vadd.f32 %v2938_v13, %v3274_v6  ;;  %v1090_v16 = vadd.f32 %v3274_v6, %v1089_v14  ;;  %v1345_v17 = vpop.f32.mrb[33].mxu1  ;;  %v2875_v18 = vpop.f32.mrb[34].mxu0 }
 0x129   : > { %2206 = vst.msk [vmem:[%s3286_s28 + $0x174] sm:$0xf] %vm2112_vm3, %v2735_v11  ;;  %v1506_v19 = vmax.f32 %v1098_v12, 0.0  ;;  %v1346_v20 = vadd.f32 %v3274_v6, %v1345_v17  ;;  %v1101_v21 = vadd.f32 %v2875_v18, %v3274_v6  ;;  %v2939_v22 = vpop.f32.mrb[34].mxu1  ;;  %v1092_v23 = vpop.f32.mrb[35].mxu0 }
 0x12a   : > { %v1570_v24 = vmax.f32 %v1354_v15, 0.0  ;;  %v1504_v25 = vmax.f32 %v1090_v16, 0.0  ;;  %v1357_v26 = vadd.f32 %v2939_v22, %v3274_v6  ;;  %v1093_v27 = vadd.f32 %v3274_v6, %v1092_v23  ;;  %v1348_v28 = vpop.f32.mrb[35].mxu1 }
 0x12b   : > { %v2676_v29 = vpack.c.bf16 %v1506_v19, %v1506_v19  ;;  %v1568_v30 = vmax.f32 %v1346_v20, 0.0  ;;  %v1507_v31 = vmax.f32 %v1101_v21, 0.0  ;;  %v1349_v32 = vadd.f32 %v3274_v6, %v1348_v28 }
 0x12c   : > { %v2740_v33 = vpack.c.bf16 %v1570_v24, %v1570_v24  ;;  %v2674_v34 = vpack.c.bf16 %v1504_v25, %v1504_v25  ;;  %v1571_v35 = vmax.f32 %v1357_v26, 0.0  ;;  %v1505_v36 = vmax.f32 %v1093_v27, 0.0 }
 0x12d   : > { %2147 = vst.msk [vmem:[%s3286_s28 + $0x88] sm:$0xf] %vm2112_vm3, %v2676_v29  ;;  %v2738_v37 = vpack.c.bf16 %v1568_v30, %v1568_v30  ;;  %v2677_v38 = vpack.c.bf16 %v1507_v31, %v1507_v31  ;;  %v1569_v39 = vmax.f32 %v1349_v32, 0.0 }
 0x12e   : > { %2211 = vst.msk [vmem:[%s3286_s28 + $0x188] sm:$0xf] %vm2112_vm3, %v2740_v33  ;;  %2145 = vst.msk [vmem:[%s3286_s28 + $0x80] sm:$0xf] %vm2112_vm3, %v2674_v34  ;;  %v2741_v40 = vpack.c.bf16 %v1571_v35, %v1571_v35  ;;  %v2675_v41 = vpack.c.bf16 %v1505_v36, %v1505_v36  ;;  %v2878_v42 = vpop.f32.mrb[36].mxu0 }
 0x12f   : > { %2209 = vst.msk [vmem:[%s3286_s28 + $0x180] sm:$0xf] %vm2112_vm3, %v2738_v37  ;;  %2148 = vst.msk [vmem:[%s3286_s28 + $0x8c] sm:$0xf] %vm2112_vm3, %v2677_v38  ;;  %v2739_v43 = vpack.c.bf16 %v1569_v39, %v1569_v39  ;;  %v1114_v44 = vadd.f32 %v2878_v42, %v3274_v6  ;;  %v2942_v45 = vpop.f32.mrb[36].mxu1  ;;  %v1105_v46 = vpop.f32.mrb[37].mxu0 }
 0x130   : > { %2212 = vst.msk [vmem:[%s3286_s28 + $0x18c] sm:$0xf] %vm2112_vm3, %v2741_v40  ;;  %2146 = vst.msk [vmem:[%s3286_s28 + $0x84] sm:$0xf] %vm2112_vm3, %v2675_v41  ;;  %v1370_v47 = vadd.f32 %v2942_v45, %v3274_v6  ;;  %v1106_v48 = vadd.f32 %v3274_v6, %v1105_v46  ;;  %v1361_v49 = vpop.f32.mrb[37].mxu1  ;;  %v2879_v50 = vpop.f32.mrb[38].mxu0 }
 0x131   : > { %2210 = vst.msk [vmem:[%s3286_s28 + $0x184] sm:$0xf] %vm2112_vm3, %v2739_v43  ;;  %v1510_v51 = vmax.f32 %v1114_v44, 0.0  ;;  %v1362_v52 = vadd.f32 %v3274_v6, %v1361_v49  ;;  %v1117_v53 = vadd.f32 %v2879_v50, %v3274_v6  ;;  %v2943_v54 = vpop.f32.mrb[38].mxu1  ;;  %v1108_v55 = vpop.f32.mrb[39].mxu0 }
 0x132   : > { %v1574_v56 = vmax.f32 %v1370_v47, 0.0  ;;  %v1508_v57 = vmax.f32 %v1106_v48, 0.0  ;;  %v1373_v58 = vadd.f32 %v2943_v54, %v3274_v6  ;;  %v1109_v59 = vadd.f32 %v3274_v6, %v1108_v55  ;;  %v1364_v60 = vpop.f32.mrb[39].mxu1 }
 0x133   : > { %v2680_v61 = vpack.c.bf16 %v1510_v51, %v1510_v51  ;;  %v1572_v62 = vmax.f32 %v1362_v52, 0.0  ;;  %v1511_v63 = vmax.f32 %v1117_v53, 0.0  ;;  %v1365_v0 = vadd.f32 %v3274_v6, %v1364_v60 }
 0x134   : > { %v2744_v1 = vpack.c.bf16 %v1574_v56, %v1574_v56  ;;  %v2678_v2 = vpack.c.bf16 %v1508_v57, %v1508_v57  ;;  %v1575_v3 = vmax.f32 %v1373_v58, 0.0  ;;  %v1509_v4 = vmax.f32 %v1109_v59, 0.0 }
 0x135   : > { %2151 = vst.msk [vmem:[%s3286_s28 + $0x98] sm:$0xf] %vm2112_vm3, %v2680_v61  ;;  %v2742_v5 = vpack.c.bf16 %v1572_v62, %v1572_v62  ;;  %v2681_v7 = vpack.c.bf16 %v1511_v63, %v1511_v63  ;;  %v1573_v8 = vmax.f32 %v1365_v0, 0.0 }
 0x136   : > { %2215 = vst.msk [vmem:[%s3286_s28 + $0x198] sm:$0xf] %vm2112_vm3, %v2744_v1  ;;  %2149 = vst.msk [vmem:[%s3286_s28 + $0x90] sm:$0xf] %vm2112_vm3, %v2678_v2  ;;  %v2745_v9 = vpack.c.bf16 %v1575_v3, %v1575_v3  ;;  %v2679_v10 = vpack.c.bf16 %v1509_v4, %v1509_v4  ;;  %v2882_v11 = vpop.f32.mrb[40].mxu0 }
 0x137   : > { %2213 = vst.msk [vmem:[%s3286_s28 + $0x190] sm:$0xf] %vm2112_vm3, %v2742_v5  ;;  %2152 = vst.msk [vmem:[%s3286_s28 + $0x9c] sm:$0xf] %vm2112_vm3, %v2681_v7  ;;  %v2743_v12 = vpack.c.bf16 %v1573_v8, %v1573_v8  ;;  %v1130_v13 = vadd.f32 %v2882_v11, %v3274_v6  ;;  %v2946_v14 = vpop.f32.mrb[40].mxu1  ;;  %v1121_v15 = vpop.f32.mrb[41].mxu0 }
 0x138   : > { %2216 = vst.msk [vmem:[%s3286_s28 + $0x19c] sm:$0xf] %vm2112_vm3, %v2745_v9  ;;  %2150 = vst.msk [vmem:[%s3286_s28 + $0x94] sm:$0xf] %vm2112_vm3, %v2679_v10  ;;  %v1386_v16 = vadd.f32 %v2946_v14, %v3274_v6  ;;  %v1122_v17 = vadd.f32 %v3274_v6, %v1121_v15  ;;  %v1377_v18 = vpop.f32.mrb[41].mxu1  ;;  %v2883_v19 = vpop.f32.mrb[42].mxu0 }
 0x139   : > { %2214 = vst.msk [vmem:[%s3286_s28 + $0x194] sm:$0xf] %vm2112_vm3, %v2743_v12  ;;  %v1514_v20 = vmax.f32 %v1130_v13, 0.0  ;;  %v1378_v21 = vadd.f32 %v3274_v6, %v1377_v18  ;;  %v1133_v22 = vadd.f32 %v2883_v19, %v3274_v6  ;;  %v2947_v23 = vpop.f32.mrb[42].mxu1  ;;  %v1124_v24 = vpop.f32.mrb[43].mxu0 }
 0x13a   : > { %v1578_v25 = vmax.f32 %v1386_v16, 0.0  ;;  %v1512_v26 = vmax.f32 %v1122_v17, 0.0  ;;  %v1389_v27 = vadd.f32 %v2947_v23, %v3274_v6  ;;  %v1125_v28 = vadd.f32 %v3274_v6, %v1124_v24  ;;  %v1380_v29 = vpop.f32.mrb[43].mxu1 }
 0x13b   : > { %v2684_v30 = vpack.c.bf16 %v1514_v20, %v1514_v20  ;;  %v1576_v31 = vmax.f32 %v1378_v21, 0.0  ;;  %v1515_v32 = vmax.f32 %v1133_v22, 0.0  ;;  %v1381_v33 = vadd.f32 %v3274_v6, %v1380_v29 }
 0x13c   : > { %v2748_v34 = vpack.c.bf16 %v1578_v25, %v1578_v25  ;;  %v2682_v35 = vpack.c.bf16 %v1512_v26, %v1512_v26  ;;  %v1579_v36 = vmax.f32 %v1389_v27, 0.0  ;;  %v1513_v37 = vmax.f32 %v1125_v28, 0.0 }
 0x13d   : > { %2155 = vst.msk [vmem:[%s3286_s28 + $0xa8] sm:$0xf] %vm2112_vm3, %v2684_v30  ;;  %v2746_v38 = vpack.c.bf16 %v1576_v31, %v1576_v31  ;;  %v2685_v39 = vpack.c.bf16 %v1515_v32, %v1515_v32  ;;  %v1577_v40 = vmax.f32 %v1381_v33, 0.0 }
 0x13e   : > { %2219 = vst.msk [vmem:[%s3286_s28 + $0x1a8] sm:$0xf] %vm2112_vm3, %v2748_v34  ;;  %2153 = vst.msk [vmem:[%s3286_s28 + $0xa0] sm:$0xf] %vm2112_vm3, %v2682_v35  ;;  %v2749_v41 = vpack.c.bf16 %v1579_v36, %v1579_v36  ;;  %v2683_v42 = vpack.c.bf16 %v1513_v37, %v1513_v37  ;;  %v2886_v43 = vpop.f32.mrb[44].mxu0 }
 0x13f   : > { %2217 = vst.msk [vmem:[%s3286_s28 + $0x1a0] sm:$0xf] %vm2112_vm3, %v2746_v38  ;;  %2156 = vst.msk [vmem:[%s3286_s28 + $0xac] sm:$0xf] %vm2112_vm3, %v2685_v39  ;;  %v2747_v44 = vpack.c.bf16 %v1577_v40, %v1577_v40  ;;  %v1146_v45 = vadd.f32 %v2886_v43, %v3274_v6  ;;  %v2950_v46 = vpop.f32.mrb[44].mxu1  ;;  %v1137_v47 = vpop.f32.mrb[45].mxu0 }
 0x140   : > { %2220 = vst.msk [vmem:[%s3286_s28 + $0x1ac] sm:$0xf] %vm2112_vm3, %v2749_v41  ;;  %2154 = vst.msk [vmem:[%s3286_s28 + $0xa4] sm:$0xf] %vm2112_vm3, %v2683_v42  ;;  %v1402_v48 = vadd.f32 %v2950_v46, %v3274_v6  ;;  %v1138_v49 = vadd.f32 %v3274_v6, %v1137_v47  ;;  %v1393_v50 = vpop.f32.mrb[45].mxu1  ;;  %v2887_v51 = vpop.f32.mrb[46].mxu0 }
 0x141   : > { %2218 = vst.msk [vmem:[%s3286_s28 + $0x1a4] sm:$0xf] %vm2112_vm3, %v2747_v44  ;;  %v1518_v52 = vmax.f32 %v1146_v45, 0.0  ;;  %v1394_v53 = vadd.f32 %v3274_v6, %v1393_v50  ;;  %v1149_v54 = vadd.f32 %v2887_v51, %v3274_v6  ;;  %v2951_v55 = vpop.f32.mrb[46].mxu1  ;;  %v1140_v56 = vpop.f32.mrb[47].mxu0 }
 0x142   : > { %v1582_v57 = vmax.f32 %v1402_v48, 0.0  ;;  %v1516_v58 = vmax.f32 %v1138_v49, 0.0  ;;  %v1405_v59 = vadd.f32 %v2951_v55, %v3274_v6  ;;  %v1141_v60 = vadd.f32 %v3274_v6, %v1140_v56  ;;  %v1396_v61 = vpop.f32.mrb[47].mxu1  ;;  %v3592_v45 = vld [vmem:[%s3683_s2] ss:$0 sm:$0xff] }
 0x143   : > { %v2688_v62 = vpack.c.bf16 %v1518_v52, %v1518_v52  ;;  %v1580_v63 = vmax.f32 %v1394_v53, 0.0  ;;  %v1519_v0 = vmax.f32 %v1149_v54, 0.0  ;;  %v1397_v1 = vadd.f32 %v3274_v6, %v1396_v61 }
 0x144   : > { %v2752_v2 = vpack.c.bf16 %v1582_v57, %v1582_v57  ;;  %v2686_v3 = vpack.c.bf16 %v1516_v58, %v1516_v58  ;;  %v1583_v4 = vmax.f32 %v1405_v59, 0.0  ;;  %v1517_v5 = vmax.f32 %v1141_v60, 0.0 }
 0x145   : > { %2159 = vst.msk [vmem:[%s3286_s28 + $0xb8] sm:$0xf] %vm2112_vm3, %v2688_v62  ;;  %v2750_v7 = vpack.c.bf16 %v1580_v63, %v1580_v63  ;;  %v2689_v8 = vpack.c.bf16 %v1519_v0, %v1519_v0  ;;  %v1581_v9 = vmax.f32 %v1397_v1, 0.0 }
 0x146   : > { %2223 = vst.msk [vmem:[%s3286_s28 + $0x1b8] sm:$0xf] %vm2112_vm3, %v2752_v2  ;;  %2157 = vst.msk [vmem:[%s3286_s28 + $0xb0] sm:$0xf] %vm2112_vm3, %v2686_v3  ;;  %v2753_v10 = vpack.c.bf16 %v1583_v4, %v1583_v4  ;;  %v2687_v11 = vpack.c.bf16 %v1517_v5, %v1517_v5  ;;  %v2890_v12 = vpop.f32.mrb[48].mxu0 }
 0x147   : > { %2221 = vst.msk [vmem:[%s3286_s28 + $0x1b0] sm:$0xf] %vm2112_vm3, %v2750_v7  ;;  %2160 = vst.msk [vmem:[%s3286_s28 + $0xbc] sm:$0xf] %vm2112_vm3, %v2689_v8  ;;  %v2751_v13 = vpack.c.bf16 %v1581_v9, %v1581_v9  ;;  %v1162_v14 = vadd.f32 %v2890_v12, %v3274_v6  ;;  %v2954_v15 = vpop.f32.mrb[48].mxu1  ;;  %v1153_v16 = vpop.f32.mrb[49].mxu0 }
 0x148   : > { %2224 = vst.msk [vmem:[%s3286_s28 + $0x1bc] sm:$0xf] %vm2112_vm3, %v2753_v10  ;;  %2158 = vst.msk [vmem:[%s3286_s28 + $0xb4] sm:$0xf] %vm2112_vm3, %v2687_v11  ;;  %v1418_v17 = vadd.f32 %v2954_v15, %v3274_v6  ;;  %v1154_v18 = vadd.f32 %v3274_v6, %v1153_v16  ;;  %v1409_v19 = vpop.f32.mrb[49].mxu1  ;;  %v2891_v20 = vpop.f32.mrb[50].mxu0 }
 0x149   : > { %2222 = vst.msk [vmem:[%s3286_s28 + $0x1b4] sm:$0xf] %vm2112_vm3, %v2751_v13  ;;  %v1522_v21 = vmax.f32 %v1162_v14, 0.0  ;;  %v1410_v22 = vadd.f32 %v3274_v6, %v1409_v19  ;;  %v1165_v23 = vadd.f32 %v2891_v20, %v3274_v6  ;;  %v2955_v24 = vpop.f32.mrb[50].mxu1  ;;  %v1156_v25 = vpop.f32.mrb[51].mxu0 }
 0x14a   : > { %v1586_v26 = vmax.f32 %v1418_v17, 0.0  ;;  %v1520_v27 = vmax.f32 %v1154_v18, 0.0  ;;  %v1421_v28 = vadd.f32 %v2955_v24, %v3274_v6  ;;  %v1157_v29 = vadd.f32 %v3274_v6, %v1156_v25  ;;  %v1412_v30 = vpop.f32.mrb[51].mxu1 }
 0x14b   : > { %v2692_v31 = vpack.c.bf16 %v1522_v21, %v1522_v21  ;;  %v1584_v32 = vmax.f32 %v1410_v22, 0.0  ;;  %v1523_v33 = vmax.f32 %v1165_v23, 0.0  ;;  %v1413_v34 = vadd.f32 %v3274_v6, %v1412_v30 }
 0x14c   : > { %v2756_v35 = vpack.c.bf16 %v1586_v26, %v1586_v26  ;;  %v2690_v36 = vpack.c.bf16 %v1520_v27, %v1520_v27  ;;  %v1587_v37 = vmax.f32 %v1421_v28, 0.0  ;;  %v1521_v38 = vmax.f32 %v1157_v29, 0.0 }
 0x14d   : > { %2163 = vst.msk [vmem:[%s3286_s28 + $0xc8] sm:$0xf] %vm2112_vm3, %v2692_v31  ;;  %v2754_v39 = vpack.c.bf16 %v1584_v32, %v1584_v32  ;;  %v2693_v40 = vpack.c.bf16 %v1523_v33, %v1523_v33  ;;  %v1585_v41 = vmax.f32 %v1413_v34, 0.0 }
 0x14e   : > { %2227 = vst.msk [vmem:[%s3286_s28 + $0x1c8] sm:$0xf] %vm2112_vm3, %v2756_v35  ;;  %2161 = vst.msk [vmem:[%s3286_s28 + $0xc0] sm:$0xf] %vm2112_vm3, %v2690_v36  ;;  %v2757_v42 = vpack.c.bf16 %v1587_v37, %v1587_v37  ;;  %v2691_v43 = vpack.c.bf16 %v1521_v38, %v1521_v38  ;;  %v2894_v44 = vpop.f32.mrb[52].mxu0 }
 0x14f   : > { %2225 = vst.msk [vmem:[%s3286_s28 + $0x1c0] sm:$0xf] %vm2112_vm3, %v2754_v39  ;;  %2164 = vst.msk [vmem:[%s3286_s28 + $0xcc] sm:$0xf] %vm2112_vm3, %v2693_v40  ;;  %v2755_v6 = vpack.c.bf16 %v1585_v41, %v1585_v41  ;;  %v1178_v46 = vadd.f32 %v3592_v45, %v2894_v44  ;;  %v2958_v47 = vpop.f32.mrb[52].mxu1  ;;  %v1169_v48 = vpop.f32.mrb[53].mxu0 }
 0x150   : > { %2228 = vst.msk [vmem:[%s3286_s28 + $0x1cc] sm:$0xf] %vm2112_vm3, %v2757_v42  ;;  %2162 = vst.msk [vmem:[%s3286_s28 + $0xc4] sm:$0xf] %vm2112_vm3, %v2691_v43  ;;  %v1434_v49 = vadd.f32 %v3592_v45, %v2958_v47  ;;  %v1170_v50 = vadd.f32 %v3592_v45, %v1169_v48  ;;  %v1425_v51 = vpop.f32.mrb[53].mxu1  ;;  %v2895_v52 = vpop.f32.mrb[54].mxu0 }
 0x151   : > { %2226 = vst.msk [vmem:[%s3286_s28 + $0x1c4] sm:$0xf] %vm2112_vm3, %v2755_v6  ;;  %v1526_v53 = vmax.f32 %v1178_v46, 0.0  ;;  %v1426_v54 = vadd.f32 %v3592_v45, %v1425_v51  ;;  %v1181_v55 = vadd.f32 %v3592_v45, %v2895_v52  ;;  %v2959_v56 = vpop.f32.mrb[54].mxu1  ;;  %v1172_v57 = vpop.f32.mrb[55].mxu0 }
 0x152   : > { %v1590_v58 = vmax.f32 %v1434_v49, 0.0  ;;  %v1524_v59 = vmax.f32 %v1170_v50, 0.0  ;;  %v1437_v60 = vadd.f32 %v3592_v45, %v2959_v56  ;;  %v1173_v61 = vadd.f32 %v3592_v45, %v1172_v57  ;;  %v1428_v62 = vpop.f32.mrb[55].mxu1 }
 0x153   : > { %v2696_v63 = vpack.c.bf16 %v1526_v53, %v1526_v53  ;;  %v1588_v0 = vmax.f32 %v1426_v54, 0.0  ;;  %v1527_v1 = vmax.f32 %v1181_v55, 0.0  ;;  %v1429_v2 = vadd.f32 %v3592_v45, %v1428_v62 }
 0x154   : > { %v2760_v3 = vpack.c.bf16 %v1590_v58, %v1590_v58  ;;  %v2694_v4 = vpack.c.bf16 %v1524_v59, %v1524_v59  ;;  %v1591_v5 = vmax.f32 %v1437_v60, 0.0  ;;  %v1525_v7 = vmax.f32 %v1173_v61, 0.0 }
 0x155   : > { %2167 = vst.msk [vmem:[%s3286_s28 + $0xd8] sm:$0xf] %vm2112_vm3, %v2696_v63  ;;  %v2758_v8 = vpack.c.bf16 %v1588_v0, %v1588_v0  ;;  %v2697_v9 = vpack.c.bf16 %v1527_v1, %v1527_v1  ;;  %v1589_v10 = vmax.f32 %v1429_v2, 0.0 }
 0x156   : > { %2231 = vst.msk [vmem:[%s3286_s28 + $0x1d8] sm:$0xf] %vm2112_vm3, %v2760_v3  ;;  %2165 = vst.msk [vmem:[%s3286_s28 + $0xd0] sm:$0xf] %vm2112_vm3, %v2694_v4  ;;  %v2761_v11 = vpack.c.bf16 %v1591_v5, %v1591_v5  ;;  %v2695_v12 = vpack.c.bf16 %v1525_v7, %v1525_v7  ;;  %v2898_v13 = vpop.f32.mrb[56].mxu0 }
 0x157   : > { %2229 = vst.msk [vmem:[%s3286_s28 + $0x1d0] sm:$0xf] %vm2112_vm3, %v2758_v8  ;;  %2168 = vst.msk [vmem:[%s3286_s28 + $0xdc] sm:$0xf] %vm2112_vm3, %v2697_v9  ;;  %v2759_v14 = vpack.c.bf16 %v1589_v10, %v1589_v10  ;;  %v1194_v15 = vadd.f32 %v3592_v45, %v2898_v13  ;;  %v2962_v16 = vpop.f32.mrb[56].mxu1  ;;  %v1185_v17 = vpop.f32.mrb[57].mxu0 }
 0x158   : > { %2232 = vst.msk [vmem:[%s3286_s28 + $0x1dc] sm:$0xf] %vm2112_vm3, %v2761_v11  ;;  %2166 = vst.msk [vmem:[%s3286_s28 + $0xd4] sm:$0xf] %vm2112_vm3, %v2695_v12  ;;  %v1450_v18 = vadd.f32 %v3592_v45, %v2962_v16  ;;  %v1186_v19 = vadd.f32 %v3592_v45, %v1185_v17  ;;  %v1441_v20 = vpop.f32.mrb[57].mxu1  ;;  %v2899_v21 = vpop.f32.mrb[58].mxu0 }
 0x159   : > { %2230 = vst.msk [vmem:[%s3286_s28 + $0x1d4] sm:$0xf] %vm2112_vm3, %v2759_v14  ;;  %v1530_v22 = vmax.f32 %v1194_v15, 0.0  ;;  %v1442_v23 = vadd.f32 %v3592_v45, %v1441_v20  ;;  %v1197_v24 = vadd.f32 %v3592_v45, %v2899_v21  ;;  %v2963_v25 = vpop.f32.mrb[58].mxu1  ;;  %v1188_v26 = vpop.f32.mrb[59].mxu0 }
 0x15a   : > { %v1594_v27 = vmax.f32 %v1450_v18, 0.0  ;;  %v1528_v28 = vmax.f32 %v1186_v19, 0.0  ;;  %v1453_v29 = vadd.f32 %v3592_v45, %v2963_v25  ;;  %v1189_v30 = vadd.f32 %v3592_v45, %v1188_v26  ;;  %v1444_v31 = vpop.f32.mrb[59].mxu1 }
 0x15b   : > { %v2700_v32 = vpack.c.bf16 %v1530_v22, %v1530_v22  ;;  %v1592_v33 = vmax.f32 %v1442_v23, 0.0  ;;  %v1531_v34 = vmax.f32 %v1197_v24, 0.0  ;;  %v1445_v35 = vadd.f32 %v3592_v45, %v1444_v31 }
 0x15c   : > { %v2764_v36 = vpack.c.bf16 %v1594_v27, %v1594_v27  ;;  %v2698_v37 = vpack.c.bf16 %v1528_v28, %v1528_v28  ;;  %v1595_v38 = vmax.f32 %v1453_v29, 0.0  ;;  %v1529_v39 = vmax.f32 %v1189_v30, 0.0 }
 0x15d   : > { %2171 = vst.msk [vmem:[%s3286_s28 + $0xe8] sm:$0xf] %vm2112_vm3, %v2700_v32  ;;  %v2762_v40 = vpack.c.bf16 %v1592_v33, %v1592_v33  ;;  %v2701_v41 = vpack.c.bf16 %v1531_v34, %v1531_v34  ;;  %v1593_v42 = vmax.f32 %v1445_v35, 0.0 }
 0x15e   : > { %2235 = vst.msk [vmem:[%s3286_s28 + $0x1e8] sm:$0xf] %vm2112_vm3, %v2764_v36  ;;  %2169 = vst.msk [vmem:[%s3286_s28 + $0xe0] sm:$0xf] %vm2112_vm3, %v2698_v37  ;;  %v2765_v43 = vpack.c.bf16 %v1595_v38, %v1595_v38  ;;  %v2699_v44 = vpack.c.bf16 %v1529_v39, %v1529_v39  ;;  %v2902_v6 = vpop.f32.mrb[60].mxu0 }
 0x15f   : > { %2233 = vst.msk [vmem:[%s3286_s28 + $0x1e0] sm:$0xf] %vm2112_vm3, %v2762_v40  ;;  %2172 = vst.msk [vmem:[%s3286_s28 + $0xec] sm:$0xf] %vm2112_vm3, %v2701_v41  ;;  %v2763_v46 = vpack.c.bf16 %v1593_v42, %v1593_v42  ;;  %v1210_v47 = vadd.f32 %v3592_v45, %v2902_v6  ;;  %v2966_v48 = vpop.f32.mrb[60].mxu1  ;;  %v1201_v49 = vpop.f32.mrb[61].mxu0 }
 0x160   : > { %2236 = vst.msk [vmem:[%s3286_s28 + $0x1ec] sm:$0xf] %vm2112_vm3, %v2765_v43  ;;  %2170 = vst.msk [vmem:[%s3286_s28 + $0xe4] sm:$0xf] %vm2112_vm3, %v2699_v44  ;;  %v1466_v50 = vadd.f32 %v3592_v45, %v2966_v48  ;;  %v1202_v51 = vadd.f32 %v3592_v45, %v1201_v49  ;;  %v1457_v52 = vpop.f32.mrb[61].mxu1  ;;  %v2903_v53 = vpop.f32.mrb[62].mxu0 }
 0x161   : > { %2234 = vst.msk [vmem:[%s3286_s28 + $0x1e4] sm:$0xf] %vm2112_vm3, %v2763_v46  ;;  %v1534_v54 = vmax.f32 %v1210_v47, 0.0  ;;  %v1458_v55 = vadd.f32 %v3592_v45, %v1457_v52  ;;  %v1213_v56 = vadd.f32 %v3592_v45, %v2903_v53  ;;  %v2967_v57 = vpop.f32.mrb[62].mxu1  ;;  %v1204_v58 = vpop.f32.mrb[63].mxu0 }
 0x162   : > { %v1598_v59 = vmax.f32 %v1466_v50, 0.0  ;;  %v1532_v60 = vmax.f32 %v1202_v51, 0.0  ;;  %v1469_v61 = vadd.f32 %v3592_v45, %v2967_v57  ;;  %v1205_v62 = vadd.f32 %v3592_v45, %v1204_v58  ;;  %v1460_v63 = vpop.f32.mrb[63].mxu1 }
 0x163   : > { %v2704_v0 = vpack.c.bf16 %v1534_v54, %v1534_v54  ;;  %v1596_v1 = vmax.f32 %v1458_v55, 0.0  ;;  %v1535_v2 = vmax.f32 %v1213_v56, 0.0  ;;  %v1461_v3 = vadd.f32 %v3592_v45, %v1460_v63 }
 0x164   : > { %v2768_v4 = vpack.c.bf16 %v1598_v59, %v1598_v59  ;;  %v2702_v5 = vpack.c.bf16 %v1532_v60, %v1532_v60  ;;  %v1599_v7 = vmax.f32 %v1469_v61, 0.0  ;;  %v1533_v8 = vmax.f32 %v1205_v62, 0.0 }
 0x165   : > { %2175 = vst.msk [vmem:[%s3286_s28 + $0xf8] sm:$0xf] %vm2112_vm3, %v2704_v0  ;;  %v2766_v9 = vpack.c.bf16 %v1596_v1, %v1596_v1  ;;  %v2705_v10 = vpack.c.bf16 %v1535_v2, %v1535_v2  ;;  %v1597_v11 = vmax.f32 %v1461_v3, 0.0 }
 0x166   : > { %2239 = vst.msk [vmem:[%s3286_s28 + $0x1f8] sm:$0xf] %vm2112_vm3, %v2768_v4  ;;  %2173 = vst.msk [vmem:[%s3286_s28 + $0xf0] sm:$0xf] %vm2112_vm3, %v2702_v5  ;;  %v2769_v12 = vpack.c.bf16 %v1599_v7, %v1599_v7  ;;  %v2703_v13 = vpack.c.bf16 %v1533_v8, %v1533_v8 }
 0x167   : > { %2237 = vst.msk [vmem:[%s3286_s28 + $0x1f0] sm:$0xf] %vm2112_vm3, %v2766_v9  ;;  %2176 = vst.msk [vmem:[%s3286_s28 + $0xfc] sm:$0xf] %vm2112_vm3, %v2705_v10  ;;  %v2767_v45 = vpack.c.bf16 %v1597_v11, %v1597_v11 }
 0x168   : > { %2240 = vst.msk [vmem:[%s3286_s28 + $0x1fc] sm:$0xf] %vm2112_vm3, %v2769_v12  ;;  %2174 = vst.msk [vmem:[%s3286_s28 + $0xf4] sm:$0xf] %vm2112_vm3, %v2703_v13 }
 0x169   : > { %2238 = vst.msk [vmem:[%s3286_s28 + $0x1f4] sm:$0xf] %vm2112_vm3, %v2767_v45 }
 0x16a PF: > { %s13_s14 = sadd.s32 1, %s3086_s14   ;;  %s3685_s12 = smov %s3082_s13 }
 0x16b   : > { %p10_p5 = scmp.ge.s32.totalorder %s13_s14, 4   ;;  %s3686_s13 = smov %s3688_s15 }
 0x16d   :  { %12 = sbr.rel (!%p10_p5) target bundleno = 2 (0x2), region = 68 }

</bundles_post_ra>
